<compile_context>
chip_gen: v6e
topology: v6e:2x2x1
jax: 0.10.0
libtpu: 0.0.40
codegen_flags: <defaults>
</compile_context>

<pallas_src>
import functools

import jax
import jax.numpy as jnp
from jax import lax
from jax.experimental import pallas as pl
from jax.experimental.pallas import tpu as pltpu


def _aspp_kernel(x_ref, w_ref, b_ref, gamma_ref, beta_ref, coord_ref,
                 o_ref, col_ref, *, D, H, W, dil, cin, cout, num_groups):
    """One grid step == one batch sample.

    x_ref     : [1, Cin, M]        sample, spatial flattened into lanes (M = D*H*W)
    w_ref     : [Cout, 27*Cin]     conv taps, K index = ((kd,kh,kw), cin)
    b_ref     : [Cout, 1]          conv bias
    gamma_ref : [Cout, 1]          GroupNorm weight
    beta_ref  : [Cout, 1]          GroupNorm bias
    coord_ref : [3, M] int32       (d, h, w) coordinate of every flat position
    o_ref     : [1, Cout, M]       output (NC(DHW) -> reshaped to NCDHW outside)
    col_ref   : [27*Cin, M] f32    VMEM scratch: im2col slab
    """
    M = D * H * W
    x = x_ref[0]                                   # [Cin, M], lane-dense

    # ---- boundary masks from precomputed coords (VPU compares, no int div) ----
    d_idx = coord_ref[pl.ds(0, 1), :]              # [1, M] int32
    h_idx = coord_ref[pl.ds(1, 1), :]
    w_idx = coord_ref[pl.ds(2, 1), :]

    def axis_masks(idx, size):
        lo = (idx >= dil).astype(jnp.float32)          # valid for a -dil shift
        hi = (idx < size - dil).astype(jnp.float32)    # valid for a +dil shift
        return {-1: lo, 0: None, 1: hi}

    md = axis_masks(d_idx, D)
    mh = axis_masks(h_idx, H)
    mw = axis_masks(w_idx, W)

    # ---- im2col into VMEM scratch via lane rolls (XLU) + masks (VPU) ----
    # tap (kd,kh,kw) reads x[d+(kd-1)*dil, h+(kh-1)*dil, w+(kw-1)*dil] -> flat
    # shift by off; circular wrap / out-of-range positions are zeroed by mask.
    t = 0
    for kd in range(3):
        for kh in range(3):
            for kw in range(3):
                off = ((kd - 1) * H * W + (kh - 1) * W + (kw - 1)) * dil
                shifted = x if off == 0 else pltpu.roll(x, shift=(-off) % M, axis=1)
                mask = None
                for m in (md[kd - 1], mh[kh - 1], mw[kw - 1]):
                    if m is not None:
                        mask = m if mask is None else mask * m
                piece = shifted if mask is None else shifted * mask   # [Cin, M]
                col_ref[pl.ds(t * cin, cin), :] = piece
                t += 1

    # ---- conv as ONE fused MXU matmul: [Cout, 27*Cin] @ [27*Cin, M] ----
    y = jnp.dot(w_ref[...], col_ref[...], preferred_element_type=jnp.float32)
    y = y + b_ref[...]                              # bias, [Cout,1] lane-broadcast

    # ---- GroupNorm(num_groups): two-pass per group (no E[x^2]-mean^2) ----
    gs = cout // num_groups
    inv_n = 1.0 / float(gs * M)
    pieces = []
    for g in range(num_groups):
        ys = y[g * gs:(g + 1) * gs, :]                                  # [gs, M]
        s = jnp.sum(jnp.sum(ys, axis=1, keepdims=True), axis=0, keepdims=True)
        mean = s * inv_n                                                # [1, 1]
        cent = ys - mean
        v = jnp.sum(jnp.sum(cent * cent, axis=1, keepdims=True),
                    axis=0, keepdims=True) * inv_n                      # [1, 1]
        inv = lax.rsqrt(v + 1e-5)
        gam = gamma_ref[pl.ds(g * gs, gs), :]                           # [gs, 1]
        bet = beta_ref[pl.ds(g * gs, gs), :]
        pieces.append(jnp.maximum(cent * inv * gam + bet, 0.0))         # ReLU
    out = jnp.concatenate(pieces, axis=0)                               # [Cout, M]

    o_ref[0] = out.astype(o_ref.dtype)              # single lane-dense store


def aspp_forward_pallas(x_ncdhw, w, b, gamma, beta, dilation, num_groups=8):
    """x_ncdhw: [N, Cin, D, H, W]; w: [Cout, Cin, 3, 3, 3] (PyTorch layout)."""
    N, Cin, D, H, W = x_ncdhw.shape
    Cout = w.shape[0]
    assert Cout % num_groups == 0, "GroupNorm needs Cout divisible by num_groups"
    dil = int(dilation)
    M = D * H * W

    # NCDHW kept as-is; only a free (contiguous) reshape of trailing dims.
    x2 = x_ncdhw.reshape(N, Cin, M).astype(jnp.float32)

    # 2-D weight matrix [Cout, 27*Cin], K ordered (kd, kh, kw, cin).
    w2 = jnp.transpose(w.astype(jnp.float32), (0, 2, 3, 4, 1)).reshape(Cout, 27 * Cin)

    b2 = b.reshape(Cout, 1).astype(jnp.float32)
    gm = gamma.reshape(Cout, 1).astype(jnp.float32)
    bt = beta.reshape(Cout, 1).astype(jnp.float32)

    # Flat-spatial coordinates for in-kernel boundary masks (tiny, DMA'd once).
    dd, hh, ww = jnp.meshgrid(jnp.arange(D, dtype=jnp.int32),
                              jnp.arange(H, dtype=jnp.int32),
                              jnp.arange(W, dtype=jnp.int32), indexing="ij")
    coords = jnp.stack([dd.reshape(-1), hh.reshape(-1), ww.reshape(-1)], axis=0)

    kernel = functools.partial(_aspp_kernel, D=D, H=H, W=W, dil=dil,
                               cin=Cin, cout=Cout, num_groups=num_groups)

    out = pl.pallas_call(
        kernel,
        out_shape=jax.ShapeDtypeStruct((N, Cout, M), jnp.float32),
        grid_spec=pltpu.PrefetchScalarGridSpec(
            num_scalar_prefetch=0,
            grid=(N,),
            in_specs=[
                pl.BlockSpec((1, Cin, M), lambda i: (i, 0, 0)),
                pl.BlockSpec((Cout, 27 * Cin), lambda i: (0, 0)),
                pl.BlockSpec((Cout, 1), lambda i: (0, 0)),
                pl.BlockSpec((Cout, 1), lambda i: (0, 0)),
                pl.BlockSpec((Cout, 1), lambda i: (0, 0)),
                pl.BlockSpec((3, M), lambda i: (0, 0)),
            ],
            out_specs=pl.BlockSpec((1, Cout, M), lambda i: (i, 0, 0)),
            scratch_shapes=[pltpu.VMEM((27 * Cin, M), jnp.float32)],
        ),
        compiler_params=pltpu.CompilerParams(
            dimension_semantics=("parallel",)),       # both TCs on v7x
    )(x2, w2, b2, gm, bt, coords)

    # free reshape back to NCDHW
    return out.reshape(N, Cout, D, H, W)


def aspp_forward_ref(x_ncdhw, w, b, gamma, beta, dilation):
    """Pure-JAX reference mirroring the PyTorch module."""
    dil = int(dilation)
    y = lax.conv_general_dilated(
        x_ncdhw.astype(jnp.float32), w.astype(jnp.float32),
        window_strides=(1, 1, 1),
        padding=[(dil, dil)] * 3,
        rhs_dilation=(dil, dil, dil),
        dimension_numbers=("NCDHW", "OIDHW", "NCDHW"))
    y = y + b[None, :, None, None, None]
    N, C = y.shape[:2]
    yg = y.reshape(N, 8, C // 8, -1)
    mean = yg.mean(axis=(2, 3), keepdims=True)
    var = ((yg - mean) ** 2).mean(axis=(2, 3), keepdims=True)
    yn = ((yg - mean) / jnp.sqrt(var + 1e-5)).reshape(y.shape)
    yn = yn * gamma[None, :, None, None, None] + beta[None, :, None, None, None]
    return jnp.maximum(yn, 0.0)


if __name__ == "__main__":
    # ASPPModule(inplanes=4, outplanes=16, dilation=2) at small spatial size
    N, Cin, Cout, D, H, W, dilation = 2, 4, 16, 8, 8, 8, 2

    key = jax.random.PRNGKey(0)
    kx, kw, kb, kg, kbt = jax.random.split(key, 5)
    x = jax.random.normal(kx, (N, Cin, D, H, W), dtype=jnp.float32)
    conv_w = jax.random.normal(kw, (Cout, Cin, 3, 3, 3), dtype=jnp.float32) * 0.1
    conv_b = jax.random.normal(kb, (Cout,), dtype=jnp.float32) * 0.1
    gn_gamma = 1.0 + 0.1 * jax.random.normal(kg, (Cout,), dtype=jnp.float32)
    gn_beta = 0.1 * jax.random.normal(kbt, (Cout,), dtype=jnp.float32)

    out = aspp_forward_pallas(x, conv_w, conv_b, gn_gamma, gn_beta, dilation)
    out = jax.block_until_ready(out)

    ref = aspp_forward_ref(x, conv_w, conv_b, gn_gamma, gn_beta, dilation)
    ref = jax.block_until_ready(ref)

    assert out.shape == (N, Cout, D, H, W), out.shape
    err = float(jnp.max(jnp.abs(out - ref)))
    assert err < 1e-3, err
    print("KERNEL_OK")
</pallas_src>

<mosaic_0001>
module attributes {stable_mosaic.version = 11 : i64} {
  func.func @_aspp_kernel(%arg0: i32, %arg1: memref<1x4x512xf32, #tpu.memory_space<vmem>>, %arg2: memref<16x108xf32, #tpu.memory_space<vmem>>, %arg3: memref<16x1xf32, #tpu.memory_space<vmem>>, %arg4: memref<16x1xf32, #tpu.memory_space<vmem>>, %arg5: memref<16x1xf32, #tpu.memory_space<vmem>>, %arg6: memref<3x512xi32, #tpu.memory_space<vmem>>, %arg7: memref<1x16x512xf32, #tpu.memory_space<vmem>>, %arg8: memref<108x512xf32, #tpu.memory_space<vmem>>) attributes {dimension_semantics = [#tpu.dimension_semantics<parallel>], iteration_bounds = array<i64: 2>, scalar_prefetch = 0 : i64, scratch_operands = 1 : i64, tpu.core_type = #tpu.core_type<tc>, window_params = [{transform_indices = @transform_0, window_bounds = array<i64: 1, 4, 512>}, {pipeline_mode = #tpu.pipeline_mode<synchronous>, transform_indices = @transform_1, window_bounds = array<i64: 16, 108>}, {pipeline_mode = #tpu.pipeline_mode<synchronous>, transform_indices = @transform_2, window_bounds = array<i64: 16, 1>}, {pipeline_mode = #tpu.pipeline_mode<synchronous>, transform_indices = @transform_3, window_bounds = array<i64: 16, 1>}, {pipeline_mode = #tpu.pipeline_mode<synchronous>, transform_indices = @transform_4, window_bounds = array<i64: 16, 1>}, {pipeline_mode = #tpu.pipeline_mode<synchronous>, transform_indices = @transform_5, window_bounds = array<i64: 3, 512>}, {transform_indices = @transform_6, window_bounds = array<i64: 1, 16, 512>}]} {
    %c0 = arith.constant 0 : index
    %c0_0 = arith.constant 0 : index
    %c0_1 = arith.constant 0 : index
    %0 = vector.load %arg1[%c0, %c0_0, %c0_1] : memref<1x4x512xf32, #tpu.memory_space<vmem>>, vector<1x4x512xf32>
    %1 = vector.shape_cast %0 : vector<1x4x512xf32> to vector<4x512xf32>
    %c0_2 = arith.constant 0 : index
    %c0_3 = arith.constant 0 : index
    %2 = vector.load %arg6[%c0_2, %c0_3] : memref<3x512xi32, #tpu.memory_space<vmem>>, vector<1x512xi32>
    %c1 = arith.constant 1 : index
    %c0_4 = arith.constant 0 : index
    %3 = vector.load %arg6[%c1, %c0_4] : memref<3x512xi32, #tpu.memory_space<vmem>>, vector<1x512xi32>
    %c2 = arith.constant 2 : index
    %c0_5 = arith.constant 0 : index
    %4 = vector.load %arg6[%c2, %c0_5] : memref<3x512xi32, #tpu.memory_space<vmem>>, vector<1x512xi32>
    %c2_i32 = arith.constant 2 : i32
    %5 = vector.broadcast %c2_i32 : i32 to vector<1x512xi32>
    %6 = arith.cmpi sge, %2, %5 : vector<1x512xi32>
    %7 = arith.extui %6 : vector<1x512xi1> to vector<1x512xi32>
    %8 = arith.sitofp %7 : vector<1x512xi32> to vector<1x512xf32>
    %c6_i32 = arith.constant 6 : i32
    %9 = vector.broadcast %c6_i32 : i32 to vector<1x512xi32>
    %10 = arith.cmpi slt, %2, %9 : vector<1x512xi32>
    %11 = arith.extui %10 : vector<1x512xi1> to vector<1x512xi32>
    %12 = arith.sitofp %11 : vector<1x512xi32> to vector<1x512xf32>
    %c2_i32_6 = arith.constant 2 : i32
    %13 = vector.broadcast %c2_i32_6 : i32 to vector<1x512xi32>
    %14 = arith.cmpi sge, %3, %13 : vector<1x512xi32>
    %15 = arith.extui %14 : vector<1x512xi1> to vector<1x512xi32>
    %16 = arith.sitofp %15 : vector<1x512xi32> to vector<1x512xf32>
    %c6_i32_7 = arith.constant 6 : i32
    %17 = vector.broadcast %c6_i32_7 : i32 to vector<1x512xi32>
    %18 = arith.cmpi slt, %3, %17 : vector<1x512xi32>
    %19 = arith.extui %18 : vector<1x512xi1> to vector<1x512xi32>
    %20 = arith.sitofp %19 : vector<1x512xi32> to vector<1x512xf32>
    %c2_i32_8 = arith.constant 2 : i32
    %21 = vector.broadcast %c2_i32_8 : i32 to vector<1x512xi32>
    %22 = arith.cmpi sge, %4, %21 : vector<1x512xi32>
    %23 = arith.extui %22 : vector<1x512xi1> to vector<1x512xi32>
    %24 = arith.sitofp %23 : vector<1x512xi32> to vector<1x512xf32>
    %c6_i32_9 = arith.constant 6 : i32
    %25 = vector.broadcast %c6_i32_9 : i32 to vector<1x512xi32>
    %26 = arith.cmpi slt, %4, %25 : vector<1x512xi32>
    %27 = arith.extui %26 : vector<1x512xi1> to vector<1x512xi32>
    %28 = arith.sitofp %27 : vector<1x512xi32> to vector<1x512xf32>
    %c146_i32 = arith.constant 146 : i32
    %29 = tpu.dynamic_rotate %1 by %c146_i32 dim 1 : vector<4x512xf32>, i32 -> vector<4x512xf32>
    %30 = arith.mulf %8, %16 : vector<1x512xf32>
    %31 = arith.mulf %30, %24 : vector<1x512xf32>
    %32 = vector.broadcast %31 : vector<1x512xf32> to vector<4x512xf32>
    %33 = arith.mulf %29, %32 : vector<4x512xf32>
    %c0_10 = arith.constant 0 : index
    %c0_11 = arith.constant 0 : index
    %34 = vector.load %arg8[%c0_10, %c0_11] : memref<108x512xf32, #tpu.memory_space<vmem>>, vector<4x512xf32>
    tpu.vector_store %arg8[%c0_10, %c0_11], %33 {strides = array<i32>} : memref<108x512xf32, #tpu.memory_space<vmem>>, vector<4x512xf32>,
    %c144_i32 = arith.constant 144 : i32
    %35 = tpu.dynamic_rotate %1 by %c144_i32 dim 1 : vector<4x512xf32>, i32 -> vector<4x512xf32>
    %36 = arith.mulf %8, %16 : vector<1x512xf32>
    %37 = vector.broadcast %36 : vector<1x512xf32> to vector<4x512xf32>
    %38 = arith.mulf %35, %37 : vector<4x512xf32>
    %c4 = arith.constant 4 : index
    %c0_12 = arith.constant 0 : index
    %39 = vector.load %arg8[%c4, %c0_12] : memref<108x512xf32, #tpu.memory_space<vmem>>, vector<4x512xf32>
    tpu.vector_store %arg8[%c4, %c0_12], %38 {strides = array<i32>} : memref<108x512xf32, #tpu.memory_space<vmem>>, vector<4x512xf32>,
    %c142_i32 = arith.constant 142 : i32
    %40 = tpu.dynamic_rotate %1 by %c142_i32 dim 1 : vector<4x512xf32>, i32 -> vector<4x512xf32>
    %41 = arith.mulf %8, %16 : vector<1x512xf32>
    %42 = arith.mulf %41, %28 : vector<1x512xf32>
    %43 = vector.broadcast %42 : vector<1x512xf32> to vector<4x512xf32>
    %44 = arith.mulf %40, %43 : vector<4x512xf32>
    %c8 = arith.constant 8 : index
    %c0_13 = arith.constant 0 : index
    %45 = vector.load %arg8[%c8, %c0_13] : memref<108x512xf32, #tpu.memory_space<vmem>>, vector<4x512xf32>
    tpu.vector_store %arg8[%c8, %c0_13], %44 {strides = array<i32>} : memref<108x512xf32, #tpu.memory_space<vmem>>, vector<4x512xf32>,
    %c130_i32 = arith.constant 130 : i32
    %46 = tpu.dynamic_rotate %1 by %c130_i32 dim 1 : vector<4x512xf32>, i32 -> vector<4x512xf32>
    %47 = arith.mulf %8, %24 : vector<1x512xf32>
    %48 = vector.broadcast %47 : vector<1x512xf32> to vector<4x512xf32>
    %49 = arith.mulf %46, %48 : vector<4x512xf32>
    %c12 = arith.constant 12 : index
    %c0_14 = arith.constant 0 : index
    %50 = vector.load %arg8[%c12, %c0_14] : memref<108x512xf32, #tpu.memory_space<vmem>>, vector<4x512xf32>
    tpu.vector_store %arg8[%c12, %c0_14], %49 {strides = array<i32>} : memref<108x512xf32, #tpu.memory_space<vmem>>, vector<4x512xf32>,
    %c128_i32 = arith.constant 128 : i32
    %51 = tpu.dynamic_rotate %1 by %c128_i32 dim 1 : vector<4x512xf32>, i32 -> vector<4x512xf32>
    %52 = vector.broadcast %8 : vector<1x512xf32> to vector<4x512xf32>
    %53 = arith.mulf %51, %52 : vector<4x512xf32>
    %c16 = arith.constant 16 : index
    %c0_15 = arith.constant 0 : index
    %54 = vector.load %arg8[%c16, %c0_15] : memref<108x512xf32, #tpu.memory_space<vmem>>, vector<4x512xf32>
    tpu.vector_store %arg8[%c16, %c0_15], %53 {strides = array<i32>} : memref<108x512xf32, #tpu.memory_space<vmem>>, vector<4x512xf32>,
    %c126_i32 = arith.constant 126 : i32
    %55 = tpu.dynamic_rotate %1 by %c126_i32 dim 1 : vector<4x512xf32>, i32 -> vector<4x512xf32>
    %56 = arith.mulf %8, %28 : vector<1x512xf32>
    %57 = vector.broadcast %56 : vector<1x512xf32> to vector<4x512xf32>
    %58 = arith.mulf %55, %57 : vector<4x512xf32>
    %c20 = arith.constant 20 : index
    %c0_16 = arith.constant 0 : index
    %59 = vector.load %arg8[%c20, %c0_16] : memref<108x512xf32, #tpu.memory_space<vmem>>, vector<4x512xf32>
    tpu.vector_store %arg8[%c20, %c0_16], %58 {strides = array<i32>} : memref<108x512xf32, #tpu.memory_space<vmem>>, vector<4x512xf32>,
    %c114_i32 = arith.constant 114 : i32
    %60 = tpu.dynamic_rotate %1 by %c114_i32 dim 1 : vector<4x512xf32>, i32 -> vector<4x512xf32>
    %61 = arith.mulf %8, %20 : vector<1x512xf32>
    %62 = arith.mulf %61, %24 : vector<1x512xf32>
    %63 = vector.broadcast %62 : vector<1x512xf32> to vector<4x512xf32>
    %64 = arith.mulf %60, %63 : vector<4x512xf32>
    %c24 = arith.constant 24 : index
    %c0_17 = arith.constant 0 : index
    %65 = vector.load %arg8[%c24, %c0_17] : memref<108x512xf32, #tpu.memory_space<vmem>>, vector<4x512xf32>
    tpu.vector_store %arg8[%c24, %c0_17], %64 {strides = array<i32>} : memref<108x512xf32, #tpu.memory_space<vmem>>, vector<4x512xf32>,
    %c112_i32 = arith.constant 112 : i32
    %66 = tpu.dynamic_rotate %1 by %c112_i32 dim 1 : vector<4x512xf32>, i32 -> vector<4x512xf32>
    %67 = arith.mulf %8, %20 : vector<1x512xf32>
    %68 = vector.broadcast %67 : vector<1x512xf32> to vector<4x512xf32>
    %69 = arith.mulf %66, %68 : vector<4x512xf32>
    %c28 = arith.constant 28 : index
    %c0_18 = arith.constant 0 : index
    %70 = vector.load %arg8[%c28, %c0_18] : memref<108x512xf32, #tpu.memory_space<vmem>>, vector<4x512xf32>
    tpu.vector_store %arg8[%c28, %c0_18], %69 {strides = array<i32>} : memref<108x512xf32, #tpu.memory_space<vmem>>, vector<4x512xf32>,
    %c110_i32 = arith.constant 110 : i32
    %71 = tpu.dynamic_rotate %1 by %c110_i32 dim 1 : vector<4x512xf32>, i32 -> vector<4x512xf32>
    %72 = arith.mulf %8, %20 : vector<1x512xf32>
    %73 = arith.mulf %72, %28 : vector<1x512xf32>
    %74 = vector.broadcast %73 : vector<1x512xf32> to vector<4x512xf32>
    %75 = arith.mulf %71, %74 : vector<4x512xf32>
    %c32 = arith.constant 32 : index
    %c0_19 = arith.constant 0 : index
    %76 = vector.load %arg8[%c32, %c0_19] : memref<108x512xf32, #tpu.memory_space<vmem>>, vector<4x512xf32>
    tpu.vector_store %arg8[%c32, %c0_19], %75 {strides = array<i32>} : memref<108x512xf32, #tpu.memory_space<vmem>>, vector<4x512xf32>,
    %c18_i32 = arith.constant 18 : i32
    %77 = tpu.dynamic_rotate %1 by %c18_i32 dim 1 : vector<4x512xf32>, i32 -> vector<4x512xf32>
    %78 = arith.mulf %16, %24 : vector<1x512xf32>
    %79 = vector.broadcast %78 : vector<1x512xf32> to vector<4x512xf32>
    %80 = arith.mulf %77, %79 : vector<4x512xf32>
    %c36 = arith.constant 36 : index
    %c0_20 = arith.constant 0 : index
    %81 = vector.load %arg8[%c36, %c0_20] : memref<108x512xf32, #tpu.memory_space<vmem>>, vector<4x512xf32>
    tpu.vector_store %arg8[%c36, %c0_20], %80 {strides = array<i32>} : memref<108x512xf32, #tpu.memory_space<vmem>>, vector<4x512xf32>,
    %c16_i32 = arith.constant 16 : i32
    %82 = tpu.dynamic_rotate %1 by %c16_i32 dim 1 : vector<4x512xf32>, i32 -> vector<4x512xf32>
    %83 = vector.broadcast %16 : vector<1x512xf32> to vector<4x512xf32>
    %84 = arith.mulf %82, %83 : vector<4x512xf32>
    %c40 = arith.constant 40 : index
    %c0_21 = arith.constant 0 : index
    %85 = vector.load %arg8[%c40, %c0_21] : memref<108x512xf32, #tpu.memory_space<vmem>>, vector<4x512xf32>
    tpu.vector_store %arg8[%c40, %c0_21], %84 {strides = array<i32>} : memref<108x512xf32, #tpu.memory_space<vmem>>, vector<4x512xf32>,
    %c14_i32 = arith.constant 14 : i32
    %86 = tpu.dynamic_rotate %1 by %c14_i32 dim 1 : vector<4x512xf32>, i32 -> vector<4x512xf32>
    %87 = arith.mulf %16, %28 : vector<1x512xf32>
    %88 = vector.broadcast %87 : vector<1x512xf32> to vector<4x512xf32>
    %89 = arith.mulf %86, %88 : vector<4x512xf32>
    %c44 = arith.constant 44 : index
    %c0_22 = arith.constant 0 : index
    %90 = vector.load %arg8[%c44, %c0_22] : memref<108x512xf32, #tpu.memory_space<vmem>>, vector<4x512xf32>
    tpu.vector_store %arg8[%c44, %c0_22], %89 {strides = array<i32>} : memref<108x512xf32, #tpu.memory_space<vmem>>, vector<4x512xf32>,
    %c2_i32_23 = arith.constant 2 : i32
    %91 = tpu.dynamic_rotate %1 by %c2_i32_23 dim 1 : vector<4x512xf32>, i32 -> vector<4x512xf32>
    %92 = vector.broadcast %24 : vector<1x512xf32> to vector<4x512xf32>
    %93 = arith.mulf %91, %92 : vector<4x512xf32>
    %c48 = arith.constant 48 : index
    %c0_24 = arith.constant 0 : index
    %94 = vector.load %arg8[%c48, %c0_24] : memref<108x512xf32, #tpu.memory_space<vmem>>, vector<4x512xf32>
    tpu.vector_store %arg8[%c48, %c0_24], %93 {strides = array<i32>} : memref<108x512xf32, #tpu.memory_space<vmem>>, vector<4x512xf32>,
    %c52 = arith.constant 52 : index
    %c0_25 = arith.constant 0 : index
    %95 = vector.load %arg8[%c52, %c0_25] : memref<108x512xf32, #tpu.memory_space<vmem>>, vector<4x512xf32>
    tpu.vector_store %arg8[%c52, %c0_25], %1 {strides = array<i32>} : memref<108x512xf32, #tpu.memory_space<vmem>>, vector<4x512xf32>,
    %c510_i32 = arith.constant 510 : i32
    %96 = tpu.dynamic_rotate %1 by %c510_i32 dim 1 : vector<4x512xf32>, i32 -> vector<4x512xf32>
    %97 = vector.broadcast %28 : vector<1x512xf32> to vector<4x512xf32>
    %98 = arith.mulf %96, %97 : vector<4x512xf32>
    %c56 = arith.constant 56 : index
    %c0_26 = arith.constant 0 : index
    %99 = vector.load %arg8[%c56, %c0_26] : memref<108x512xf32, #tpu.memory_space<vmem>>, vector<4x512xf32>
    tpu.vector_store %arg8[%c56, %c0_26], %98 {strides = array<i32>} : memref<108x512xf32, #tpu.memory_space<vmem>>, vector<4x512xf32>,
    %c498_i32 = arith.constant 498 : i32
    %100 = tpu.dynamic_rotate %1 by %c498_i32 dim 1 : vector<4x512xf32>, i32 -> vector<4x512xf32>
    %101 = arith.mulf %20, %24 : vector<1x512xf32>
    %102 = vector.broadcast %101 : vector<1x512xf32> to vector<4x512xf32>
    %103 = arith.mulf %100, %102 : vector<4x512xf32>
    %c60 = arith.constant 60 : index
    %c0_27 = arith.constant 0 : index
    %104 = vector.load %arg8[%c60, %c0_27] : memref<108x512xf32, #tpu.memory_space<vmem>>, vector<4x512xf32>
    tpu.vector_store %arg8[%c60, %c0_27], %103 {strides = array<i32>} : memref<108x512xf32, #tpu.memory_space<vmem>>, vector<4x512xf32>,
    %c496_i32 = arith.constant 496 : i32
    %105 = tpu.dynamic_rotate %1 by %c496_i32 dim 1 : vector<4x512xf32>, i32 -> vector<4x512xf32>
    %106 = vector.broadcast %20 : vector<1x512xf32> to vector<4x512xf32>
    %107 = arith.mulf %105, %106 : vector<4x512xf32>
    %c64 = arith.constant 64 : index
    %c0_28 = arith.constant 0 : index
    %108 = vector.load %arg8[%c64, %c0_28] : memref<108x512xf32, #tpu.memory_space<vmem>>, vector<4x512xf32>
    tpu.vector_store %arg8[%c64, %c0_28], %107 {strides = array<i32>} : memref<108x512xf32, #tpu.memory_space<vmem>>, vector<4x512xf32>,
    %c494_i32 = arith.constant 494 : i32
    %109 = tpu.dynamic_rotate %1 by %c494_i32 dim 1 : vector<4x512xf32>, i32 -> vector<4x512xf32>
    %110 = arith.mulf %20, %28 : vector<1x512xf32>
    %111 = vector.broadcast %110 : vector<1x512xf32> to vector<4x512xf32>
    %112 = arith.mulf %109, %111 : vector<4x512xf32>
    %c68 = arith.constant 68 : index
    %c0_29 = arith.constant 0 : index
    %113 = vector.load %arg8[%c68, %c0_29] : memref<108x512xf32, #tpu.memory_space<vmem>>, vector<4x512xf32>
    tpu.vector_store %arg8[%c68, %c0_29], %112 {strides = array<i32>} : memref<108x512xf32, #tpu.memory_space<vmem>>, vector<4x512xf32>,
    %c402_i32 = arith.constant 402 : i32
    %114 = tpu.dynamic_rotate %1 by %c402_i32 dim 1 : vector<4x512xf32>, i32 -> vector<4x512xf32>
    %115 = arith.mulf %12, %16 : vector<1x512xf32>
    %116 = arith.mulf %115, %24 : vector<1x512xf32>
    %117 = vector.broadcast %116 : vector<1x512xf32> to vector<4x512xf32>
    %118 = arith.mulf %114, %117 : vector<4x512xf32>
    %c72 = arith.constant 72 : index
    %c0_30 = arith.constant 0 : index
    %119 = vector.load %arg8[%c72, %c0_30] : memref<108x512xf32, #tpu.memory_space<vmem>>, vector<4x512xf32>
    tpu.vector_store %arg8[%c72, %c0_30], %118 {strides = array<i32>} : memref<108x512xf32, #tpu.memory_space<vmem>>, vector<4x512xf32>,
    %c400_i32 = arith.constant 400 : i32
    %120 = tpu.dynamic_rotate %1 by %c400_i32 dim 1 : vector<4x512xf32>, i32 -> vector<4x512xf32>
    %121 = arith.mulf %12, %16 : vector<1x512xf32>
    %122 = vector.broadcast %121 : vector<1x512xf32> to vector<4x512xf32>
    %123 = arith.mulf %120, %122 : vector<4x512xf32>
    %c76 = arith.constant 76 : index
    %c0_31 = arith.constant 0 : index
    %124 = vector.load %arg8[%c76, %c0_31] : memref<108x512xf32, #tpu.memory_space<vmem>>, vector<4x512xf32>
    tpu.vector_store %arg8[%c76, %c0_31], %123 {strides = array<i32>} : memref<108x512xf32, #tpu.memory_space<vmem>>, vector<4x512xf32>,
    %c398_i32 = arith.constant 398 : i32
    %125 = tpu.dynamic_rotate %1 by %c398_i32 dim 1 : vector<4x512xf32>, i32 -> vector<4x512xf32>
    %126 = arith.mulf %12, %16 : vector<1x512xf32>
    %127 = arith.mulf %126, %28 : vector<1x512xf32>
    %128 = vector.broadcast %127 : vector<1x512xf32> to vector<4x512xf32>
    %129 = arith.mulf %125, %128 : vector<4x512xf32>
    %c80 = arith.constant 80 : index
    %c0_32 = arith.constant 0 : index
    %130 = vector.load %arg8[%c80, %c0_32] : memref<108x512xf32, #tpu.memory_space<vmem>>, vector<4x512xf32>
    tpu.vector_store %arg8[%c80, %c0_32], %129 {strides = array<i32>} : memref<108x512xf32, #tpu.memory_space<vmem>>, vector<4x512xf32>,
    %c386_i32 = arith.constant 386 : i32
    %131 = tpu.dynamic_rotate %1 by %c386_i32 dim 1 : vector<4x512xf32>, i32 -> vector<4x512xf32>
    %132 = arith.mulf %12, %24 : vector<1x512xf32>
    %133 = vector.broadcast %132 : vector<1x512xf32> to vector<4x512xf32>
    %134 = arith.mulf %131, %133 : vector<4x512xf32>
    %c84 = arith.constant 84 : index
    %c0_33 = arith.constant 0 : index
    %135 = vector.load %arg8[%c84, %c0_33] : memref<108x512xf32, #tpu.memory_space<vmem>>, vector<4x512xf32>
    tpu.vector_store %arg8[%c84, %c0_33], %134 {strides = array<i32>} : memref<108x512xf32, #tpu.memory_space<vmem>>, vector<4x512xf32>,
    %c384_i32 = arith.constant 384 : i32
    %136 = tpu.dynamic_rotate %1 by %c384_i32 dim 1 : vector<4x512xf32>, i32 -> vector<4x512xf32>
    %137 = vector.broadcast %12 : vector<1x512xf32> to vector<4x512xf32>
    %138 = arith.mulf %136, %137 : vector<4x512xf32>
    %c88 = arith.constant 88 : index
    %c0_34 = arith.constant 0 : index
    %139 = vector.load %arg8[%c88, %c0_34] : memref<108x512xf32, #tpu.memory_space<vmem>>, vector<4x512xf32>
    tpu.vector_store %arg8[%c88, %c0_34], %138 {strides = array<i32>} : memref<108x512xf32, #tpu.memory_space<vmem>>, vector<4x512xf32>,
    %c382_i32 = arith.constant 382 : i32
    %140 = tpu.dynamic_rotate %1 by %c382_i32 dim 1 : vector<4x512xf32>, i32 -> vector<4x512xf32>
    %141 = arith.mulf %12, %28 : vector<1x512xf32>
    %142 = vector.broadcast %141 : vector<1x512xf32> to vector<4x512xf32>
    %143 = arith.mulf %140, %142 : vector<4x512xf32>
    %c92 = arith.constant 92 : index
    %c0_35 = arith.constant 0 : index
    %144 = vector.load %arg8[%c92, %c0_35] : memref<108x512xf32, #tpu.memory_space<vmem>>, vector<4x512xf32>
    tpu.vector_store %arg8[%c92, %c0_35], %143 {strides = array<i32>} : memref<108x512xf32, #tpu.memory_space<vmem>>, vector<4x512xf32>,
    %c370_i32 = arith.constant 370 : i32
    %145 = tpu.dynamic_rotate %1 by %c370_i32 dim 1 : vector<4x512xf32>, i32 -> vector<4x512xf32>
    %146 = arith.mulf %12, %20 : vector<1x512xf32>
    %147 = arith.mulf %146, %24 : vector<1x512xf32>
    %148 = vector.broadcast %147 : vector<1x512xf32> to vector<4x512xf32>
    %149 = arith.mulf %145, %148 : vector<4x512xf32>
    %c96 = arith.constant 96 : index
    %c0_36 = arith.constant 0 : index
    %150 = vector.load %arg8[%c96, %c0_36] : memref<108x512xf32, #tpu.memory_space<vmem>>, vector<4x512xf32>
    tpu.vector_store %arg8[%c96, %c0_36], %149 {strides = array<i32>} : memref<108x512xf32, #tpu.memory_space<vmem>>, vector<4x512xf32>,
    %c368_i32 = arith.constant 368 : i32
    %151 = tpu.dynamic_rotate %1 by %c368_i32 dim 1 : vector<4x512xf32>, i32 -> vector<4x512xf32>
    %152 = arith.mulf %12, %20 : vector<1x512xf32>
    %153 = vector.broadcast %152 : vector<1x512xf32> to vector<4x512xf32>
    %154 = arith.mulf %151, %153 : vector<4x512xf32>
    %c100 = arith.constant 100 : index
    %c0_37 = arith.constant 0 : index
    %155 = vector.load %arg8[%c100, %c0_37] : memref<108x512xf32, #tpu.memory_space<vmem>>, vector<4x512xf32>
    tpu.vector_store %arg8[%c100, %c0_37], %154 {strides = array<i32>} : memref<108x512xf32, #tpu.memory_space<vmem>>, vector<4x512xf32>,
    %c366_i32 = arith.constant 366 : i32
    %156 = tpu.dynamic_rotate %1 by %c366_i32 dim 1 : vector<4x512xf32>, i32 -> vector<4x512xf32>
    %157 = arith.mulf %12, %20 : vector<1x512xf32>
    %158 = arith.mulf %157, %28 : vector<1x512xf32>
    %159 = vector.broadcast %158 : vector<1x512xf32> to vector<4x512xf32>
    %160 = arith.mulf %156, %159 : vector<4x512xf32>
    %c104 = arith.constant 104 : index
    %c0_38 = arith.constant 0 : index
    %161 = vector.load %arg8[%c104, %c0_38] : memref<108x512xf32, #tpu.memory_space<vmem>>, vector<4x512xf32>
    tpu.vector_store %arg8[%c104, %c0_38], %160 {strides = array<i32>} : memref<108x512xf32, #tpu.memory_space<vmem>>, vector<4x512xf32>,
    %c0_39 = arith.constant 0 : index
    %c0_40 = arith.constant 0 : index
    %162 = vector.load %arg2[%c0_39, %c0_40] : memref<16x108xf32, #tpu.memory_space<vmem>>, vector<16x108xf32>
    %c0_41 = arith.constant 0 : index
    %c0_42 = arith.constant 0 : index
    %163 = vector.load %arg8[%c0_41, %c0_42] : memref<108x512xf32, #tpu.memory_space<vmem>>, vector<108x512xf32>
    %cst = arith.constant dense<0.000000e+00> : vector<16x512xf32>
    %164 = tpu.matmul %162, %163, %cst {dimension_numbers = #tpu.dot_dimension_numbers<[1], [0], [0], [1], [0, 0, 1, 1], [], []>} : vector<16x108xf32>, vector<108x512xf32>, vector<16x512xf32> -> vector<16x512xf32>
    %c0_43 = arith.constant 0 : index
    %c0_44 = arith.constant 0 : index
    %165 = vector.load %arg3[%c0_43, %c0_44] : memref<16x1xf32, #tpu.memory_space<vmem>>, vector<16x1xf32>
    %166 = vector.broadcast %165 : vector<16x1xf32> to vector<16x512xf32>
    %167 = arith.addf %164, %166 : vector<16x512xf32>
    %168 = vector.extract_strided_slice %167 {offsets = [0, 0], sizes = [2, 512], strides = [1, 1]} : vector<16x512xf32> to vector<2x512xf32>
    %cst_45 = arith.constant dense<0.000000e+00> : vector<2xf32>
    %169 = vector.multi_reduction <add>, %168, %cst_45 [1] : vector<2x512xf32> to vector<2xf32>
    %170 = vector.shape_cast %169 : vector<2xf32> to vector<2x1xf32>
    %cst_46 = arith.constant dense<0.000000e+00> : vector<1xf32>
    %171 = vector.multi_reduction <add>, %170, %cst_46 [0] : vector<2x1xf32> to vector<1xf32>
    %172 = vector.shape_cast %171 : vector<1xf32> to vector<1x1xf32>
    %cst_47 = arith.constant 9.765625E-4 : f32
    %173 = vector.broadcast %cst_47 : f32 to vector<1x1xf32>
    %174 = arith.mulf %172, %173 : vector<1x1xf32>
    %175 = vector.broadcast %174 : vector<1x1xf32> to vector<2x512xf32>
    %176 = arith.subf %168, %175 : vector<2x512xf32>
    %177 = arith.mulf %176, %176 : vector<2x512xf32>
    %cst_48 = arith.constant dense<0.000000e+00> : vector<2xf32>
    %178 = vector.multi_reduction <add>, %177, %cst_48 [1] : vector<2x512xf32> to vector<2xf32>
    %179 = vector.shape_cast %178 : vector<2xf32> to vector<2x1xf32>
    %cst_49 = arith.constant dense<0.000000e+00> : vector<1xf32>
    %180 = vector.multi_reduction <add>, %179, %cst_49 [0] : vector<2x1xf32> to vector<1xf32>
    %181 = vector.shape_cast %180 : vector<1xf32> to vector<1x1xf32>
    %cst_50 = arith.constant 9.765625E-4 : f32
    %182 = vector.broadcast %cst_50 : f32 to vector<1x1xf32>
    %183 = arith.mulf %181, %182 : vector<1x1xf32>
    %cst_51 = arith.constant 9.99999974E-6 : f32
    %184 = vector.broadcast %cst_51 : f32 to vector<1x1xf32>
    %185 = arith.addf %183, %184 : vector<1x1xf32>
    %186 = math.rsqrt %185 : vector<1x1xf32>
    %c0_52 = arith.constant 0 : index
    %c0_53 = arith.constant 0 : index
    %187 = vector.load %arg4[%c0_52, %c0_53] : memref<16x1xf32, #tpu.memory_space<vmem>>, vector<2x1xf32>
    %c0_54 = arith.constant 0 : index
    %c0_55 = arith.constant 0 : index
    %188 = vector.load %arg5[%c0_54, %c0_55] : memref<16x1xf32, #tpu.memory_space<vmem>>, vector<2x1xf32>
    %189 = vector.broadcast %186 : vector<1x1xf32> to vector<2x512xf32>
    %190 = arith.mulf %176, %189 : vector<2x512xf32>
    %191 = vector.broadcast %187 : vector<2x1xf32> to vector<2x512xf32>
    %192 = arith.mulf %190, %191 : vector<2x512xf32>
    %193 = vector.broadcast %188 : vector<2x1xf32> to vector<2x512xf32>
    %194 = arith.addf %192, %193 : vector<2x512xf32>
    %cst_56 = arith.constant 0.000000e+00 : f32
    %195 = vector.broadcast %cst_56 : f32 to vector<2x512xf32>
    %196 = arith.maximumf %194, %195 : vector<2x512xf32>
    %197 = vector.extract_strided_slice %167 {offsets = [2, 0], sizes = [2, 512], strides = [1, 1]} : vector<16x512xf32> to vector<2x512xf32>
    %cst_57 = arith.constant dense<0.000000e+00> : vector<2xf32>
    %198 = vector.multi_reduction <add>, %197, %cst_57 [1] : vector<2x512xf32> to vector<2xf32>
    %199 = vector.shape_cast %198 : vector<2xf32> to vector<2x1xf32>
    %cst_58 = arith.constant dense<0.000000e+00> : vector<1xf32>
    %200 = vector.multi_reduction <add>, %199, %cst_58 [0] : vector<2x1xf32> to vector<1xf32>
    %201 = vector.shape_cast %200 : vector<1xf32> to vector<1x1xf32>
    %cst_59 = arith.constant 9.765625E-4 : f32
    %202 = vector.broadcast %cst_59 : f32 to vector<1x1xf32>
    %203 = arith.mulf %201, %202 : vector<1x1xf32>
    %204 = vector.broadcast %203 : vector<1x1xf32> to vector<2x512xf32>
    %205 = arith.subf %197, %204 : vector<2x512xf32>
    %206 = arith.mulf %205, %205 : vector<2x512xf32>
    %cst_60 = arith.constant dense<0.000000e+00> : vector<2xf32>
    %207 = vector.multi_reduction <add>, %206, %cst_60 [1] : vector<2x512xf32> to vector<2xf32>
    %208 = vector.shape_cast %207 : vector<2xf32> to vector<2x1xf32>
    %cst_61 = arith.constant dense<0.000000e+00> : vector<1xf32>
    %209 = vector.multi_reduction <add>, %208, %cst_61 [0] : vector<2x1xf32> to vector<1xf32>
    %210 = vector.shape_cast %209 : vector<1xf32> to vector<1x1xf32>
    %cst_62 = arith.constant 9.765625E-4 : f32
    %211 = vector.broadcast %cst_62 : f32 to vector<1x1xf32>
    %212 = arith.mulf %210, %211 : vector<1x1xf32>
    %cst_63 = arith.constant 9.99999974E-6 : f32
    %213 = vector.broadcast %cst_63 : f32 to vector<1x1xf32>
    %214 = arith.addf %212, %213 : vector<1x1xf32>
    %215 = math.rsqrt %214 : vector<1x1xf32>
    %c2_64 = arith.constant 2 : index
    %c0_65 = arith.constant 0 : index
    %216 = vector.load %arg4[%c2_64, %c0_65] : memref<16x1xf32, #tpu.memory_space<vmem>>, vector<2x1xf32>
    %c2_66 = arith.constant 2 : index
    %c0_67 = arith.constant 0 : index
    %217 = vector.load %arg5[%c2_66, %c0_67] : memref<16x1xf32, #tpu.memory_space<vmem>>, vector<2x1xf32>
    %218 = vector.broadcast %215 : vector<1x1xf32> to vector<2x512xf32>
    %219 = arith.mulf %205, %218 : vector<2x512xf32>
    %220 = vector.broadcast %216 : vector<2x1xf32> to vector<2x512xf32>
    %221 = arith.mulf %219, %220 : vector<2x512xf32>
    %222 = vector.broadcast %217 : vector<2x1xf32> to vector<2x512xf32>
    %223 = arith.addf %221, %222 : vector<2x512xf32>
    %cst_68 = arith.constant 0.000000e+00 : f32
    %224 = vector.broadcast %cst_68 : f32 to vector<2x512xf32>
    %225 = arith.maximumf %223, %224 : vector<2x512xf32>
    %226 = vector.extract_strided_slice %167 {offsets = [4, 0], sizes = [2, 512], strides = [1, 1]} : vector<16x512xf32> to vector<2x512xf32>
    %cst_69 = arith.constant dense<0.000000e+00> : vector<2xf32>
    %227 = vector.multi_reduction <add>, %226, %cst_69 [1] : vector<2x512xf32> to vector<2xf32>
    %228 = vector.shape_cast %227 : vector<2xf32> to vector<2x1xf32>
    %cst_70 = arith.constant dense<0.000000e+00> : vector<1xf32>
    %229 = vector.multi_reduction <add>, %228, %cst_70 [0] : vector<2x1xf32> to vector<1xf32>
    %230 = vector.shape_cast %229 : vector<1xf32> to vector<1x1xf32>
    %cst_71 = arith.constant 9.765625E-4 : f32
    %231 = vector.broadcast %cst_71 : f32 to vector<1x1xf32>
    %232 = arith.mulf %230, %231 : vector<1x1xf32>
    %233 = vector.broadcast %232 : vector<1x1xf32> to vector<2x512xf32>
    %234 = arith.subf %226, %233 : vector<2x512xf32>
    %235 = arith.mulf %234, %234 : vector<2x512xf32>
    %cst_72 = arith.constant dense<0.000000e+00> : vector<2xf32>
    %236 = vector.multi_reduction <add>, %235, %cst_72 [1] : vector<2x512xf32> to vector<2xf32>
    %237 = vector.shape_cast %236 : vector<2xf32> to vector<2x1xf32>
    %cst_73 = arith.constant dense<0.000000e+00> : vector<1xf32>
    %238 = vector.multi_reduction <add>, %237, %cst_73 [0] : vector<2x1xf32> to vector<1xf32>
    %239 = vector.shape_cast %238 : vector<1xf32> to vector<1x1xf32>
    %cst_74 = arith.constant 9.765625E-4 : f32
    %240 = vector.broadcast %cst_74 : f32 to vector<1x1xf32>
    %241 = arith.mulf %239, %240 : vector<1x1xf32>
    %cst_75 = arith.constant 9.99999974E-6 : f32
    %242 = vector.broadcast %cst_75 : f32 to vector<1x1xf32>
    %243 = arith.addf %241, %242 : vector<1x1xf32>
    %244 = math.rsqrt %243 : vector<1x1xf32>
    %c4_76 = arith.constant 4 : index
    %c0_77 = arith.constant 0 : index
    %245 = vector.load %arg4[%c4_76, %c0_77] : memref<16x1xf32, #tpu.memory_space<vmem>>, vector<2x1xf32>
    %c4_78 = arith.constant 4 : index
    %c0_79 = arith.constant 0 : index
    %246 = vector.load %arg5[%c4_78, %c0_79] : memref<16x1xf32, #tpu.memory_space<vmem>>, vector<2x1xf32>
    %247 = vector.broadcast %244 : vector<1x1xf32> to vector<2x512xf32>
    %248 = arith.mulf %234, %247 : vector<2x512xf32>
    %249 = vector.broadcast %245 : vector<2x1xf32> to vector<2x512xf32>
    %250 = arith.mulf %248, %249 : vector<2x512xf32>
    %251 = vector.broadcast %246 : vector<2x1xf32> to vector<2x512xf32>
    %252 = arith.addf %250, %251 : vector<2x512xf32>
    %cst_80 = arith.constant 0.000000e+00 : f32
    %253 = vector.broadcast %cst_80 : f32 to vector<2x512xf32>
    %254 = arith.maximumf %252, %253 : vector<2x512xf32>
    %255 = vector.extract_strided_slice %167 {offsets = [6, 0], sizes = [2, 512], strides = [1, 1]} : vector<16x512xf32> to vector<2x512xf32>
    %cst_81 = arith.constant dense<0.000000e+00> : vector<2xf32>
    %256 = vector.multi_reduction <add>, %255, %cst_81 [1] : vector<2x512xf32> to vector<2xf32>
    %257 = vector.shape_cast %256 : vector<2xf32> to vector<2x1xf32>
    %cst_82 = arith.constant dense<0.000000e+00> : vector<1xf32>
    %258 = vector.multi_reduction <add>, %257, %cst_82 [0] : vector<2x1xf32> to vector<1xf32>
    %259 = vector.shape_cast %258 : vector<1xf32> to vector<1x1xf32>
    %cst_83 = arith.constant 9.765625E-4 : f32
    %260 = vector.broadcast %cst_83 : f32 to vector<1x1xf32>
    %261 = arith.mulf %259, %260 : vector<1x1xf32>
    %262 = vector.broadcast %261 : vector<1x1xf32> to vector<2x512xf32>
    %263 = arith.subf %255, %262 : vector<2x512xf32>
    %264 = arith.mulf %263, %263 : vector<2x512xf32>
    %cst_84 = arith.constant dense<0.000000e+00> : vector<2xf32>
    %265 = vector.multi_reduction <add>, %264, %cst_84 [1] : vector<2x512xf32> to vector<2xf32>
    %266 = vector.shape_cast %265 : vector<2xf32> to vector<2x1xf32>
    %cst_85 = arith.constant dense<0.000000e+00> : vector<1xf32>
    %267 = vector.multi_reduction <add>, %266, %cst_85 [0] : vector<2x1xf32> to vector<1xf32>
    %268 = vector.shape_cast %267 : vector<1xf32> to vector<1x1xf32>
    %cst_86 = arith.constant 9.765625E-4 : f32
    %269 = vector.broadcast %cst_86 : f32 to vector<1x1xf32>
    %270 = arith.mulf %268, %269 : vector<1x1xf32>
    %cst_87 = arith.constant 9.99999974E-6 : f32
    %271 = vector.broadcast %cst_87 : f32 to vector<1x1xf32>
    %272 = arith.addf %270, %271 : vector<1x1xf32>
    %273 = math.rsqrt %272 : vector<1x1xf32>
    %c6 = arith.constant 6 : index
    %c0_88 = arith.constant 0 : index
    %274 = vector.load %arg4[%c6, %c0_88] : memref<16x1xf32, #tpu.memory_space<vmem>>, vector<2x1xf32>
    %c6_89 = arith.constant 6 : index
    %c0_90 = arith.constant 0 : index
    %275 = vector.load %arg5[%c6_89, %c0_90] : memref<16x1xf32, #tpu.memory_space<vmem>>, vector<2x1xf32>
    %276 = vector.broadcast %273 : vector<1x1xf32> to vector<2x512xf32>
    %277 = arith.mulf %263, %276 : vector<2x512xf32>
    %278 = vector.broadcast %274 : vector<2x1xf32> to vector<2x512xf32>
    %279 = arith.mulf %277, %278 : vector<2x512xf32>
    %280 = vector.broadcast %275 : vector<2x1xf32> to vector<2x512xf32>
    %281 = arith.addf %279, %280 : vector<2x512xf32>
    %cst_91 = arith.constant 0.000000e+00 : f32
    %282 = vector.broadcast %cst_91 : f32 to vector<2x512xf32>
    %283 = arith.maximumf %281, %282 : vector<2x512xf32>
    %284 = vector.extract_strided_slice %167 {offsets = [8, 0], sizes = [2, 512], strides = [1, 1]} : vector<16x512xf32> to vector<2x512xf32>
    %cst_92 = arith.constant dense<0.000000e+00> : vector<2xf32>
    %285 = vector.multi_reduction <add>, %284, %cst_92 [1] : vector<2x512xf32> to vector<2xf32>
    %286 = vector.shape_cast %285 : vector<2xf32> to vector<2x1xf32>
    %cst_93 = arith.constant dense<0.000000e+00> : vector<1xf32>
    %287 = vector.multi_reduction <add>, %286, %cst_93 [0] : vector<2x1xf32> to vector<1xf32>
    %288 = vector.shape_cast %287 : vector<1xf32> to vector<1x1xf32>
    %cst_94 = arith.constant 9.765625E-4 : f32
    %289 = vector.broadcast %cst_94 : f32 to vector<1x1xf32>
    %290 = arith.mulf %288, %289 : vector<1x1xf32>
    %291 = vector.broadcast %290 : vector<1x1xf32> to vector<2x512xf32>
    %292 = arith.subf %284, %291 : vector<2x512xf32>
    %293 = arith.mulf %292, %292 : vector<2x512xf32>
    %cst_95 = arith.constant dense<0.000000e+00> : vector<2xf32>
    %294 = vector.multi_reduction <add>, %293, %cst_95 [1] : vector<2x512xf32> to vector<2xf32>
    %295 = vector.shape_cast %294 : vector<2xf32> to vector<2x1xf32>
    %cst_96 = arith.constant dense<0.000000e+00> : vector<1xf32>
    %296 = vector.multi_reduction <add>, %295, %cst_96 [0] : vector<2x1xf32> to vector<1xf32>
    %297 = vector.shape_cast %296 : vector<1xf32> to vector<1x1xf32>
    %cst_97 = arith.constant 9.765625E-4 : f32
    %298 = vector.broadcast %cst_97 : f32 to vector<1x1xf32>
    %299 = arith.mulf %297, %298 : vector<1x1xf32>
    %cst_98 = arith.constant 9.99999974E-6 : f32
    %300 = vector.broadcast %cst_98 : f32 to vector<1x1xf32>
    %301 = arith.addf %299, %300 : vector<1x1xf32>
    %302 = math.rsqrt %301 : vector<1x1xf32>
    %c8_99 = arith.constant 8 : index
    %c0_100 = arith.constant 0 : index
    %303 = vector.load %arg4[%c8_99, %c0_100] : memref<16x1xf32, #tpu.memory_space<vmem>>, vector<2x1xf32>
    %c8_101 = arith.constant 8 : index
    %c0_102 = arith.constant 0 : index
    %304 = vector.load %arg5[%c8_101, %c0_102] : memref<16x1xf32, #tpu.memory_space<vmem>>, vector<2x1xf32>
    %305 = vector.broadcast %302 : vector<1x1xf32> to vector<2x512xf32>
    %306 = arith.mulf %292, %305 : vector<2x512xf32>
    %307 = vector.broadcast %303 : vector<2x1xf32> to vector<2x512xf32>
    %308 = arith.mulf %306, %307 : vector<2x512xf32>
    %309 = vector.broadcast %304 : vector<2x1xf32> to vector<2x512xf32>
    %310 = arith.addf %308, %309 : vector<2x512xf32>
    %cst_103 = arith.constant 0.000000e+00 : f32
    %311 = vector.broadcast %cst_103 : f32 to vector<2x512xf32>
    %312 = arith.maximumf %310, %311 : vector<2x512xf32>
    %313 = vector.extract_strided_slice %167 {offsets = [10, 0], sizes = [2, 512], strides = [1, 1]} : vector<16x512xf32> to vector<2x512xf32>
    %cst_104 = arith.constant dense<0.000000e+00> : vector<2xf32>
    %314 = vector.multi_reduction <add>, %313, %cst_104 [1] : vector<2x512xf32> to vector<2xf32>
    %315 = vector.shape_cast %314 : vector<2xf32> to vector<2x1xf32>
    %cst_105 = arith.constant dense<0.000000e+00> : vector<1xf32>
    %316 = vector.multi_reduction <add>, %315, %cst_105 [0] : vector<2x1xf32> to vector<1xf32>
    %317 = vector.shape_cast %316 : vector<1xf32> to vector<1x1xf32>
    %cst_106 = arith.constant 9.765625E-4 : f32
    %318 = vector.broadcast %cst_106 : f32 to vector<1x1xf32>
    %319 = arith.mulf %317, %318 : vector<1x1xf32>
    %320 = vector.broadcast %319 : vector<1x1xf32> to vector<2x512xf32>
    %321 = arith.subf %313, %320 : vector<2x512xf32>
    %322 = arith.mulf %321, %321 : vector<2x512xf32>
    %cst_107 = arith.constant dense<0.000000e+00> : vector<2xf32>
    %323 = vector.multi_reduction <add>, %322, %cst_107 [1] : vector<2x512xf32> to vector<2xf32>
    %324 = vector.shape_cast %323 : vector<2xf32> to vector<2x1xf32>
    %cst_108 = arith.constant dense<0.000000e+00> : vector<1xf32>
    %325 = vector.multi_reduction <add>, %324, %cst_108 [0] : vector<2x1xf32> to vector<1xf32>
    %326 = vector.shape_cast %325 : vector<1xf32> to vector<1x1xf32>
    %cst_109 = arith.constant 9.765625E-4 : f32
    %327 = vector.broadcast %cst_109 : f32 to vector<1x1xf32>
    %328 = arith.mulf %326, %327 : vector<1x1xf32>
    %cst_110 = arith.constant 9.99999974E-6 : f32
    %329 = vector.broadcast %cst_110 : f32 to vector<1x1xf32>
    %330 = arith.addf %328, %329 : vector<1x1xf32>
    %331 = math.rsqrt %330 : vector<1x1xf32>
    %c10 = arith.constant 10 : index
    %c0_111 = arith.constant 0 : index
    %332 = vector.load %arg4[%c10, %c0_111] : memref<16x1xf32, #tpu.memory_space<vmem>>, vector<2x1xf32>
    %c10_112 = arith.constant 10 : index
    %c0_113 = arith.constant 0 : index
    %333 = vector.load %arg5[%c10_112, %c0_113] : memref<16x1xf32, #tpu.memory_space<vmem>>, vector<2x1xf32>
    %334 = vector.broadcast %331 : vector<1x1xf32> to vector<2x512xf32>
    %335 = arith.mulf %321, %334 : vector<2x512xf32>
    %336 = vector.broadcast %332 : vector<2x1xf32> to vector<2x512xf32>
    %337 = arith.mulf %335, %336 : vector<2x512xf32>
    %338 = vector.broadcast %333 : vector<2x1xf32> to vector<2x512xf32>
    %339 = arith.addf %337, %338 : vector<2x512xf32>
    %cst_114 = arith.constant 0.000000e+00 : f32
    %340 = vector.broadcast %cst_114 : f32 to vector<2x512xf32>
    %341 = arith.maximumf %339, %340 : vector<2x512xf32>
    %342 = vector.extract_strided_slice %167 {offsets = [12, 0], sizes = [2, 512], strides = [1, 1]} : vector<16x512xf32> to vector<2x512xf32>
    %cst_115 = arith.constant dense<0.000000e+00> : vector<2xf32>
    %343 = vector.multi_reduction <add>, %342, %cst_115 [1] : vector<2x512xf32> to vector<2xf32>
    %344 = vector.shape_cast %343 : vector<2xf32> to vector<2x1xf32>
    %cst_116 = arith.constant dense<0.000000e+00> : vector<1xf32>
    %345 = vector.multi_reduction <add>, %344, %cst_116 [0] : vector<2x1xf32> to vector<1xf32>
    %346 = vector.shape_cast %345 : vector<1xf32> to vector<1x1xf32>
    %cst_117 = arith.constant 9.765625E-4 : f32
    %347 = vector.broadcast %cst_117 : f32 to vector<1x1xf32>
    %348 = arith.mulf %346, %347 : vector<1x1xf32>
    %349 = vector.broadcast %348 : vector<1x1xf32> to vector<2x512xf32>
    %350 = arith.subf %342, %349 : vector<2x512xf32>
    %351 = arith.mulf %350, %350 : vector<2x512xf32>
    %cst_118 = arith.constant dense<0.000000e+00> : vector<2xf32>
    %352 = vector.multi_reduction <add>, %351, %cst_118 [1] : vector<2x512xf32> to vector<2xf32>
    %353 = vector.shape_cast %352 : vector<2xf32> to vector<2x1xf32>
    %cst_119 = arith.constant dense<0.000000e+00> : vector<1xf32>
    %354 = vector.multi_reduction <add>, %353, %cst_119 [0] : vector<2x1xf32> to vector<1xf32>
    %355 = vector.shape_cast %354 : vector<1xf32> to vector<1x1xf32>
    %cst_120 = arith.constant 9.765625E-4 : f32
    %356 = vector.broadcast %cst_120 : f32 to vector<1x1xf32>
    %357 = arith.mulf %355, %356 : vector<1x1xf32>
    %cst_121 = arith.constant 9.99999974E-6 : f32
    %358 = vector.broadcast %cst_121 : f32 to vector<1x1xf32>
    %359 = arith.addf %357, %358 : vector<1x1xf32>
    %360 = math.rsqrt %359 : vector<1x1xf32>
    %c12_122 = arith.constant 12 : index
    %c0_123 = arith.constant 0 : index
    %361 = vector.load %arg4[%c12_122, %c0_123] : memref<16x1xf32, #tpu.memory_space<vmem>>, vector<2x1xf32>
    %c12_124 = arith.constant 12 : index
    %c0_125 = arith.constant 0 : index
    %362 = vector.load %arg5[%c12_124, %c0_125] : memref<16x1xf32, #tpu.memory_space<vmem>>, vector<2x1xf32>
    %363 = vector.broadcast %360 : vector<1x1xf32> to vector<2x512xf32>
    %364 = arith.mulf %350, %363 : vector<2x512xf32>
    %365 = vector.broadcast %361 : vector<2x1xf32> to vector<2x512xf32>
    %366 = arith.mulf %364, %365 : vector<2x512xf32>
    %367 = vector.broadcast %362 : vector<2x1xf32> to vector<2x512xf32>
    %368 = arith.addf %366, %367 : vector<2x512xf32>
    %cst_126 = arith.constant 0.000000e+00 : f32
    %369 = vector.broadcast %cst_126 : f32 to vector<2x512xf32>
    %370 = arith.maximumf %368, %369 : vector<2x512xf32>
    %371 = vector.extract_strided_slice %167 {offsets = [14, 0], sizes = [2, 512], strides = [1, 1]} : vector<16x512xf32> to vector<2x512xf32>
    %cst_127 = arith.constant dense<0.000000e+00> : vector<2xf32>
    %372 = vector.multi_reduction <add>, %371, %cst_127 [1] : vector<2x512xf32> to vector<2xf32>
    %373 = vector.shape_cast %372 : vector<2xf32> to vector<2x1xf32>
    %cst_128 = arith.constant dense<0.000000e+00> : vector<1xf32>
    %374 = vector.multi_reduction <add>, %373, %cst_128 [0] : vector<2x1xf32> to vector<1xf32>
    %375 = vector.shape_cast %374 : vector<1xf32> to vector<1x1xf32>
    %cst_129 = arith.constant 9.765625E-4 : f32
    %376 = vector.broadcast %cst_129 : f32 to vector<1x1xf32>
    %377 = arith.mulf %375, %376 : vector<1x1xf32>
    %378 = vector.broadcast %377 : vector<1x1xf32> to vector<2x512xf32>
    %379 = arith.subf %371, %378 : vector<2x512xf32>
    %380 = arith.mulf %379, %379 : vector<2x512xf32>
    %cst_130 = arith.constant dense<0.000000e+00> : vector<2xf32>
    %381 = vector.multi_reduction <add>, %380, %cst_130 [1] : vector<2x512xf32> to vector<2xf32>
    %382 = vector.shape_cast %381 : vector<2xf32> to vector<2x1xf32>
    %cst_131 = arith.constant dense<0.000000e+00> : vector<1xf32>
    %383 = vector.multi_reduction <add>, %382, %cst_131 [0] : vector<2x1xf32> to vector<1xf32>
    %384 = vector.shape_cast %383 : vector<1xf32> to vector<1x1xf32>
    %cst_132 = arith.constant 9.765625E-4 : f32
    %385 = vector.broadcast %cst_132 : f32 to vector<1x1xf32>
    %386 = arith.mulf %384, %385 : vector<1x1xf32>
    %cst_133 = arith.constant 9.99999974E-6 : f32
    %387 = vector.broadcast %cst_133 : f32 to vector<1x1xf32>
    %388 = arith.addf %386, %387 : vector<1x1xf32>
    %389 = math.rsqrt %388 : vector<1x1xf32>
    %c14 = arith.constant 14 : index
    %c0_134 = arith.constant 0 : index
    %390 = vector.load %arg4[%c14, %c0_134] : memref<16x1xf32, #tpu.memory_space<vmem>>, vector<2x1xf32>
    %c14_135 = arith.constant 14 : index
    %c0_136 = arith.constant 0 : index
    %391 = vector.load %arg5[%c14_135, %c0_136] : memref<16x1xf32, #tpu.memory_space<vmem>>, vector<2x1xf32>
    %392 = vector.broadcast %389 : vector<1x1xf32> to vector<2x512xf32>
    %393 = arith.mulf %379, %392 : vector<2x512xf32>
    %394 = vector.broadcast %390 : vector<2x1xf32> to vector<2x512xf32>
    %395 = arith.mulf %393, %394 : vector<2x512xf32>
    %396 = vector.broadcast %391 : vector<2x1xf32> to vector<2x512xf32>
    %397 = arith.addf %395, %396 : vector<2x512xf32>
    %cst_137 = arith.constant 0.000000e+00 : f32
    %398 = vector.broadcast %cst_137 : f32 to vector<2x512xf32>
    %399 = arith.maximumf %397, %398 : vector<2x512xf32>
    %400 = tpu.concatenate %196, %225, %254, %283, %312, %341, %370, %399 in 0 : vector<2x512xf32>, vector<2x512xf32>, vector<2x512xf32>, vector<2x512xf32>, vector<2x512xf32>, vector<2x512xf32>, vector<2x512xf32>, vector<2x512xf32> -> vector<16x512xf32>
    %c0_138 = arith.constant 0 : index
    %c0_139 = arith.constant 0 : index
    %c0_140 = arith.constant 0 : index
    %401 = vector.load %arg7[%c0_138, %c0_139, %c0_140] : memref<1x16x512xf32, #tpu.memory_space<vmem>>, vector<1x16x512xf32>
    %402 = vector.shape_cast %401 : vector<1x16x512xf32> to vector<16x512xf32>
    %403 = vector.shape_cast %400 : vector<16x512xf32> to vector<1x16x512xf32>
    tpu.vector_store %arg7[%c0_138, %c0_139, %c0_140], %403 {strides = array<i32>} : memref<1x16x512xf32, #tpu.memory_space<vmem>>, vector<1x16x512xf32>,
    return
  }
  func.func @transform_0(%arg0: i32) -> (i32, i32, i32) {
    %c0_i32 = arith.constant 0 : i32
    %c0_i32_0 = arith.constant 0 : i32
    %c0_i32_1 = arith.constant 0 : i32
    return %arg0, %c0_i32, %c0_i32_0 : i32, i32, i32
  }
  func.func @transform_1(%arg0: i32) -> (i32, i32) {
    %c0_i32 = arith.constant 0 : i32
    %c0_i32_0 = arith.constant 0 : i32
    %c0_i32_1 = arith.constant 0 : i32
    return %c0_i32, %c0_i32_0 : i32, i32
  }
  func.func @transform_2(%arg0: i32) -> (i32, i32) {
    %c0_i32 = arith.constant 0 : i32
    %c0_i32_0 = arith.constant 0 : i32
    %c0_i32_1 = arith.constant 0 : i32
    return %c0_i32, %c0_i32_0 : i32, i32
  }
  func.func @transform_3(%arg0: i32) -> (i32, i32) {
    %c0_i32 = arith.constant 0 : i32
    %c0_i32_0 = arith.constant 0 : i32
    %c0_i32_1 = arith.constant 0 : i32
    return %c0_i32, %c0_i32_0 : i32, i32
  }
  func.func @transform_4(%arg0: i32) -> (i32, i32) {
    %c0_i32 = arith.constant 0 : i32
    %c0_i32_0 = arith.constant 0 : i32
    %c0_i32_1 = arith.constant 0 : i32
    return %c0_i32, %c0_i32_0 : i32, i32
  }
  func.func @transform_5(%arg0: i32) -> (i32, i32) {
    %c0_i32 = arith.constant 0 : i32
    %c0_i32_0 = arith.constant 0 : i32
    %c0_i32_1 = arith.constant 0 : i32
    return %c0_i32, %c0_i32_0 : i32, i32
  }
  func.func @transform_6(%arg0: i32) -> (i32, i32, i32) {
    %c0_i32 = arith.constant 0 : i32
    %c0_i32_0 = arith.constant 0 : i32
    %c0_i32_1 = arith.constant 0 : i32
    return %arg0, %c0_i32, %c0_i32_0 : i32, i32, i32
  }
}

</mosaic_0001>

<bundles_post_ra>
// kernel: tpu_custom_call.1
= control target key start
LH: loop header
LB: loop body
LE: loop exit
PB: predicated region body
PF: predicated region fallthrough
CT: control target
= control target key end

     0   :  { %11 = vsyncpa [#allocation4], 0  ;;  %s3928_s0 = inlined_call_operand.vmem [shape: f32[2,4,512], index: 0, kind: input, shape index: {}]   ;;  %s3929_s1 = inlined_call_operand.vmem [shape: f32[16,108], index: 1, kind: input, shape index: {}]   ;;  %s3930_s2 = inlined_call_operand.vmem [shape: f32[16,1], index: 2, kind: input, shape index: {}]   ;;  %s3931_s3 = inlined_call_operand.vmem [shape: f32[16,1], index: 3, kind: input, shape index: {}]   ;;  %s3932_s4 = inlined_call_operand.vmem [shape: f32[16,1], index: 4, kind: input, shape index: {}]   ;;  %s3933_s5 = inlined_call_operand.hbm [shape: s32[3,512], index: 5, kind: input, shape index: {}]   ;;  %s3934_s6 = inlined_call_operand.hbm [shape: f32[2,16,512], index: 6, kind: output, shape index: {}]  }
   0x1   :  { %12 = vsyncpa [#allocation5], 0 }
   0x2   :  { %14 = vsyncpa [#allocation5 + $0x1], 0  ;;  %s2574_s21 = smov 0   ;;  %s2576_s22 = smov 0  }
   0x3   :  { %s2578_s23 = smov 0   ;;  %s2580_s24 = smov 0  }
   0x4 LB: > { %s2595_s25 = sadd.s32 4294967295, %s2523_s24   ;;  %s2319_s26 = sadd.s32 4294967294, %s2523_s24   ;;  %s2523_s24 = sphi %s2580_s24, %s3992_s24   ;;  %s2519_s23 = sphi %s2578_s23, %s3991_s23   ;;  %s2515_s22 = sphi %s2576_s22, %s3990_s22   ;;  %s2511_s21 = sphi %s2574_s21, %s3989_s21  }
   0x5   : > { %s2599_s27 = sadd.s32 1, %s2523_s24   ;;  %s158_s28 = sadd.s32 1, %s2519_s23 }
   0x6   : > { %s155_s29 = ssub.s32 %s2523_s24, %s2599_s27  ;;  %p168_p0 = scmp.ne.s32.totalorder %s2519_s23, %s2515_s22 }
   0x7   : > { %p156_p1 = scmp.eq.s32.totalorder %s155_s29, 0  ;;  %p169_p2 = scmp.eq.s32.totalorder %s2595_s25, 1 }
   0x8   : > { %p174_p3 = scmp.ne.s32.totalorder %s2515_s22, %s2511_s21  ;;  %p175_p4 = scmp.eq.s32.totalorder %s2319_s26, 1 }
   0x9   : > { %s2610_s30 = scalar_select %p156_p1, %s2519_s23, %s158_s28  }
   0xa   : > { %p2612_p5 = por %p169_p2, %p168_p0  ;;  %p2616_p6 = por %p175_p4, %p174_p3 }
   0xb   : > { %p2320_p7 = scmp.ge.s32.totalorder %s2523_s24, 1  ;;  %p182_p8 = scmp.lt.s32.totalorder %s2523_s24, 3 }
   0xc   : > { %s3939_s8 = scalar_select %p2616_p6, 1, 0 }
   0xd   : > { %p2363_p9 = scmp.eq.s32.totalorder %s2595_s25, 0  ;;  %p2623_p10 = pnand %p2320_p7, %p182_p8 }
   0xe   : > { %s2525_s10 = smov [#allocation3]  }
   0xf   : > { %s207_s11 = sshll.u32 %s2525_s10, 4  ;;  %p2355_p11 = pneg %p2623_p10  ;;  %s208_s11 = int_to_ptr.vmem [resolvable:$true] %s207_s11 }
  0x10   : > { %s2444_s12 = scalar_lea.vmem %s208_s11, 256  ;;  %p2452_p3 = scmp.lt.s32.totalorder %s208_s11, %s208_s11 }
  0x11   : > { %p2356_p12 = pnand %p2363_p9, %p2355_p11  ;;  %p2445_p0 = scmp.ne.s32.totalorder %s208_s11, %s2444_s12 }
  0x12   : > { %p2453_p4 = scmp.lt.s32.totalorder %s2444_s12, %s2444_s12 }
  0x13   : > { %p2435_p13 = pneg %p2356_p12 }
  0x14   : > { %p2454_p6 = por %p2453_p4, %p2452_p3 }
  0x15   : > { %p2447_p1 = pnand %p2445_p0, %p2435_p13 }
  0x17   : > { %p2448_p2 = pneg %p2447_p1 }
  0x19   : > { %p2455_p7 = pnand %p2454_p6, %p2448_p2 }
  0x1b   : > { %2458 = shalt.err (!%p2455_p7)
}
  0x1c   : > { %2358 = dma.hbm_to_vmem [thread:$0]  (!%p2356_p12), %s3933_s5, 256, %s208_s11, [#allocation4]  }
  0x1d   : > { %228 = sbr.rel (%p2623_p10) target bundleno = 908 (0x38c), region = 44 }
  0x22   : > { %2502 = dma.done.wait (%p2363_p9), [#allocation4], 256  }
  0x23   : > { %2504 = vsyncadd (%p2363_p9), [#allocation4], 4294967040  ;;  %p258_p8 = scmp.lt.s32.totalorder %s2595_s25, 1  ;;  %v302_v0 = vlaneseq  ;;  %v3935_v1 = vmov 0.0   ;;  %s2527_s20 = smov 110   ;;  %vm1403_vm9 = vcmask 1043456  }
  0x24   : > { %1480 = vmatprep.mubr.f32.mxu0 %v3935_v1  ;;  %1557 = vmatprep.mubr.f32.mxu1 %v3935_v1  ;;  %v265_v7 = vld [vmem:[#allocation3] ss:$4 sm:$0xf]  ;;  %s2528_s26 = smov 112   ;;  %s2529_s28 = smov 126   ;;  %vm1396_vm15 = vcmask 883712  }
  0x25   : > { %s259_s15 = scalar_select %p258_p8, %s2595_s25, 1  ;;  %v313_v2 = vshrl.u32 %v302_v0, 7  ;;  %v2668_v10 = vld [vmem:[#allocation3 + $0x1] ss:$4 sm:$0xf]  ;;  %vm270_vm0 = vcmp.ge.s32.totalorder %v265_v7, 2 }
  0x26   : > { %v269_v11 = vld [vmem:[#allocation3 + $0x2] ss:$4 sm:$0xf]  ;;  %vm273_vm1 = vcmp.lt.s32.totalorder %v265_v7, 6  ;;  %vm279_vm2 = vcmp.lt.s32.totalorder %v2668_v10, 6  ;;  %v2672_v12 = vsel %vm270_vm0, 1.0, %v3935_v1 }
  0x27   : > { %s2347_s16 = sshll.u32 %s259_s15, 4  ;;  %v2648_v3 = vsub.s32 0, %v313_v2  ;;  %v2650_v4 = vsub.s32 1, %v313_v2  ;;  %v2656_v8 = vsub.s32 3, %v313_v2  ;;  %vm285_vm3 = vcmp.lt.s32.totalorder %v269_v11, 6  ;;  %s2530_s29 = smov 114  }
  0x28   : > { %s262_s19 = scalar_lea.vmem %s3928_s0, %s2347_s16  ;;  %v2675_v13 = vsel %vm273_vm1, 1.0, %v3935_v1  ;;  %v2678_v14 = vsel %vm279_vm2, 1.0, %v3935_v1  ;;  %v2681_v15 = vsel %vm285_vm3, 1.0, %v3935_v1  ;;  %v2699_v19 = vsub.s32 2, %v313_v2  ;;  %s2531_s9 = smov 2  }
  0x29   : > { %v2652_v5 = vld [vmem:[%s262_s19 + $0x8] sm:$0xff]  ;;  %v2654_v6 = vld [vmem:[%s262_s19] sm:$0xff]  ;;  %v2685_v16 = vmul.f32 %v2678_v14, %v2672_v12  ;;  %v2689_v17 = vmul.f32 %v2678_v14, %v2675_v13  ;;  %v2703_v20 = vmul.f32 %v2681_v15, %v2672_v12  ;;  %v2737_v32 = vmul.f32 %v2681_v15, %v2675_v13  ;;  %s2532_s10 = smov 16   ;;  %s2533_s11 = smov 14  }
  0x2a   : > { %678 = vrot.lane.b32.xlu1 %v2652_v5, %s2527_s20  ;;  %864 = vst [vmem:[#allocation2 + $0xf8] sm:$0xf0] %v2654_v6  ;;  %866 = vst [vmem:[#allocation2 + $0xb8] sm:$0xf0] %v2652_v5  ;;  %624 = vrot.lane.b32.xlu0 %v2652_v5, %s2528_s26  ;;  %v2666_v9 = vcombine.high %v2652_v5, %v2652_v5  ;;  %v2697_v18 = vcombine.high %v2654_v6, %v2654_v6  ;;  %vm282_vm4 = vcmp.ge.s32.totalorder %v269_v11, 2  ;;  %s2534_s12 = smov 18  }
  0x2b   : > { %v2707_v21 = vmul.f32 %v2681_v15, %v2685_v16  ;;  %v2711_v22 = vmul.f32 %v2681_v15, %v2689_v17  ;;  %v649_v23 = vrot.slane %v2685_v16, %v2656_v8  ;;  %v1263_v24 = vrot.slane %v2689_v17, %v2650_v4  ;;  %s2536_s17 = smov [#allocation6]  }
  0x2c   : > { %v645_v25 = vrot.slane %v2685_v16, %v2699_v19  ;;  %v1259_v26 = vrot.slane %v2689_v17, %v2648_v3  ;;  %v551_v31 = vrot.slane %v2703_v20, %v2656_v8  ;;  %v2740_v33 = vsel %vm282_vm4, 1.0, %v3935_v1  ;;  %s2463_s18 = sshll.u32 %s2536_s17, 4  ;;  %s2464_s18 = int_to_ptr.vmem [resolvable:$false] %s2463_s18 }
  0x2d   : > { %v704_v27 = vrot.slane %v2707_v21, %v2656_v8  ;;  %v1305_v28 = vrot.slane %v2711_v22, %v2650_v4  ;;  %v700_v29 = vrot.slane %v2707_v21, %v2699_v19  ;;  %v1301_v30 = vrot.slane %v2711_v22, %v2648_v3  ;;  %s2465_s19 = scalar_lea.vmem %s2464_s18, 2048 }
  0x2e   : > { %680 = vrot.lane.b32.xlu1 %v2666_v9, %s2527_s20  ;;  %626 = vrot.lane.b32.xlu0 %v2666_v9, %s2528_s26  ;;  %v547_v34 = vrot.slane %v2703_v20, %v2699_v19  ;;  %v1191_v35 = vrot.slane %v2737_v32, %v2650_v4  ;;  %v2748_v36 = vmul.f32 %v2740_v33, %v2685_v16  ;;  %vm276_vm5 = vcmp.ge.s32.totalorder %v2668_v10, 2 }
  0x2f   : > { %v2752_v37 = vmul.f32 %v2740_v33, %v2689_v17  ;;  %v1161_v38 = vrot.slane %v2675_v13, %v2650_v4  ;;  %v1187_v39 = vrot.slane %v2737_v32, %v2648_v3  ;;  %v2760_v40 = vmul.f32 %v2740_v33, %v2672_v12 }
  0x30   : > { %v607_v41 = vrot.slane %v2748_v36, %v2656_v8  ;;  %v603_v43 = vrot.slane %v2748_v36, %v2699_v19  ;;  %v2778_v46 = vmul.f32 %v2740_v33, %v2675_v13  ;;  %v1157_v48 = vrot.slane %v2675_v13, %v2648_v3 }
  0x31   : > { %v1234_v42 = vrot.slane %v2752_v37, %v2650_v4  ;;  %v1230_v44 = vrot.slane %v2752_v37, %v2648_v3  ;;  %v467_v45 = vrot.slane %v2760_v40, %v2656_v8  ;;  %v1175_v47 = vmul.f32 %v1161_v38, %v2652_v5 }
  0x32   : > { %676 = vrot.lane.b32.xlu1 %v2697_v18, %s2527_s20  ;;  %622 = vrot.lane.b32.xlu0 %v2697_v18, %s2528_s26  ;;  %v692_v49 = vrot.slane %v2707_v21, %v2648_v3  ;;  %v696_v50 = vrot.slane %v2707_v21, %v2650_v4  ;;  %v508_v51 = vrot.slane %v2672_v12, %v2656_v8  ;;  %v2823_v7 = vsel %vm276_vm5, 1.0, %v3935_v1 }
  0x33   : > { %v1120_v52 = vrot.slane %v2778_v46, %v2650_v4  ;;  %1179 = vst [vmem:[#allocation2 + $0x78] sm:$0xf] %v1175_v47  ;;  %v1174_v59 = vmul.f32 %v1157_v48, %v2697_v18  ;;  %v860_v60 = vcombine.low %v2652_v5, %v2652_v5  ;;  %v504_v62 = vrot.slane %v2672_v12, %v2699_v19 }
  0x34   : > { %v516_v61 = vmul.f32 %v508_v51, %v2652_v5  ;;  %v2828_v38 = vmul.f32 %v2823_v7, %v2672_v12  ;;  %v2832_v47 = vmul.f32 %v2823_v7, %v2675_v13  ;;  %v1169_v10 = vrot.slane %v2675_v13, %v2656_v8 }
  0x35   : > { %1178 = vst [vmem:[#allocation2 + $0x70] sm:$0xf] %v1174_v59  ;;  %865 = vst [vmem:[#allocation2 + $0x190] sm:$0xf0] %v860_v60  ;;  %v515_v11 = vmul.f32 %v504_v62, %v2697_v18  ;;  %v1165_v60 = vrot.slane %v2675_v13, %v2699_v19  ;;  %v496_v1 = vrot.slane %v2672_v12, %v2648_v3  ;;  %v2988_v63 = vand.u32 127, %v302_v0 }
  0x36   : > { %527 = vrot.lane.b32.xlu1 %v2666_v9, %s2529_s28  ;;  %525 = vrot.lane.b32.xlu0 %v2652_v5, %s2529_s28  ;;  %520 = vst [vmem:[#allocation2 + $0x98] sm:$0xf] %v516_v61  ;;  %v2844_v51 = vmul.f32 %v2681_v15, %v2828_v38  ;;  %v2848_v59 = vmul.f32 %v2681_v15, %v2832_v47  ;;  %vm1570_vm0 = vcmask 1041408   ;;  %vm1643_vm1 = vcmask 1043458  }
  0x37   : > { %519 = vst [vmem:[#allocation2 + $0x118] sm:$0xf] %v515_v11  ;;  %v500_v11 = vrot.slane %v2672_v12, %v2650_v4  ;;  %v1177_v12 = vmul.f32 %v1169_v10, %v2654_v6  ;;  %v1176_v58 = vmul.f32 %v1165_v60, %v2666_v9  ;;  %v513_v13 = vmul.f32 %v496_v1, %v2666_v9  ;;  %v1385_v1 = vld [vmem:[%s3930_s2 + $0x8] sm:$0xff] }
  0x38   : > { %v2904_v10 = vmul.f32 %v2740_v33, %v2828_v38  ;;  %v2908_v60 = vmul.f32 %v2740_v33, %v2832_v47  ;;  %vm682_vm6 = vcmp.lt.s32.totalorder %v2988_v63, 110  ;;  %vm628_vm7 = vcmp.lt.s32.totalorder %v2988_v63, 112 }
  0x39   : > { %v514_v48 = vmul.f32 %v500_v11, %v2654_v6  ;;  %1181 = vst [vmem:[#allocation2 + $0x158] sm:$0xf] %v1177_v12  ;;  %1180 = vst [vmem:[#allocation2 + $0xa0] sm:$0xf] %v1176_v58  ;;  %v859_v58 = vcombine.low %v2654_v6, %v2654_v6  ;;  %v1384_v11 = vld [vmem:[%s3930_s2] sm:$0xff]  ;;  %v946_v55 = vrot.slane %v2678_v14, %v2650_v4  ;;  %vm529_vm8 = vcmp.lt.s32.totalorder %v2988_v63, 126 }
  0x3a   : > { %582 = vrot.lane.b32.xlu1 %v2666_v9, %s2530_s29  ;;  %580 = vrot.lane.b32.xlu0 %v2652_v5, %s2530_s29  ;;  %517 = vst [vmem:[#allocation2 + $0x180] sm:$0xf] %v513_v13  ;;  %vm584_vm10 = vcmp.lt.s32.totalorder %v2988_v63, 114  ;;  %vm445_vm11 = vcmp.lt.s32.totalorder %v2988_v63, 2  ;;  %vm348_vm12 = vcmp.lt.s32.totalorder %v2988_v63, 16  ;;  %vm402_vm13 = vcmp.lt.s32.totalorder %v2988_v63, 14 }
  0x3b   : > { %518 = vst [vmem:[#allocation2 + $0x110] sm:$0xf] %v514_v48  ;;  %863 = vst [vmem:[#allocation2 + $0xe8] sm:$0xf0] %v859_v58  ;;  %vm304_vm14 = vcmp.lt.s32.totalorder %v2988_v63, 18  ;;  %vm1724_vm2 = vcmask 1045508  }
  0x3c   : > { %vm1805_vm3 = vcmask 1047558   ;;  %vm2206_vm4 = vcmask 1045504  }
  0x3e   : > { %578 = vrot.lane.b32.xlu1 %v2697_v18, %s2530_s29  ;;  %523 = vrot.lane.b32.xlu0 %v2697_v18, %s2529_s28 }
  0x42   : > { %441 = vrot.lane.b32.xlu1 %v2652_v5, %s2531_s9  ;;  %439 = vrot.lane.b32.xlu0 %v2697_v18, %s2531_s9 }
  0x46   : > { %674 = vrot.lane.b32.xlu1 %v2654_v6, %s2527_s20  ;;  %620 = vrot.lane.b32.xlu0 %v2654_v6, %s2528_s26 }
  0x4a   : > { %342 = vrot.lane.b32.xlu1 %v2697_v18, %s2532_s10  ;;  %437 = vrot.lane.b32.xlu0 %v2654_v6, %s2531_s9 }
  0x4e   : > { %396 = vrot.lane.b32.xlu1 %v2697_v18, %s2533_s11  ;;  %344 = vrot.lane.b32.xlu0 %v2652_v5, %s2532_s10 }
  0x52   : > { %521 = vrot.lane.b32.xlu1 %v2654_v6, %s2529_s28  ;;  %398 = vrot.lane.b32.xlu0 %v2652_v5, %s2533_s11 }
  0x56   : > { %340 = vrot.lane.b32.xlu1 %v2654_v6, %s2532_s10  ;;  %576 = vrot.lane.b32.xlu0 %v2654_v6, %s2530_s29  ;;  %s255_s29 = sand.u32 1, %s2515_s22  }
  0x57   : > { %s3888_s15 = scalar_lea.sflag [#allocation5], %s255_s29 }
  0x5a   : > { %296 = vrot.lane.b32.xlu1 %v2697_v18, %s2534_s12  ;;  %394 = vrot.lane.b32.xlu0 %v2654_v6, %s2533_s11  ;;  %v2535_v18 = vmov 0  }
  0x5b   : > { %2412 = vset.pattern.permute.xlu1 %v2535_v18  ;;  %2411 = vset.pattern.permute.xlu0 %v2535_v18 }
  0x5e   : > { %443 = vrot.lane.b32.xlu1 %v2666_v9, %s2531_s9  ;;  %298 = vrot.lane.b32.xlu0 %v2652_v5, %s2534_s12  ;;  %v1616_v5 = vld [vmem:[%s3932_s4] sm:$0x3]  ;;  %s2325_s9 = sshll.u32 %s255_s29, 6 }
  0x62   : > { %346 = vrot.lane.b32.xlu1 %v2666_v9, %s2532_s10  ;;  %294 = vrot.lane.b32.xlu0 %v2654_v6, %s2534_s12  ;;  %v1695_v6 = vld [vmem:[%s3932_s4 + $0x2] sm:$0x3]  ;;  %s3836_s10 = scalar_lea.vmem [#allocation6], %s2325_s9 }
  0x66   : > { %300 = vrot.lane.b32.xlu1 %v2666_v9, %s2534_s12  ;;  %400 = vrot.lane.b32.xlu0 %v2666_v9, %s2533_s11  ;;  %v1776_v9 = vld [vmem:[%s3932_s4 + $0x4] sm:$0x3]  ;;  %s2348_s11 = sshll.u32 %s2595_s25, 10  ;;  %s2245_s12 = sshll.u32 %s3836_s10, 4  ;;  %s3872_s12 = int_to_ptr.vmem [resolvable:$true] %s2245_s12 }
  0x67   : > { %s3870_s14 = scalar_lea.hbm %s3934_s6, %s2348_s11  ;;  %s2459_s16 = scalar_lea.vmem %s3872_s12, 1024 }
  0x68   : > { %p2460_p6 = scmp.ne.s32.totalorder %s3872_s12, %s2459_s16  ;;  %p2466_p11 = scmp.lt.s32.totalorder %s3872_s12, %s2464_s18 }
  0x69   : > { %p2467_p12 = scmp.lt.s32.totalorder %s2465_s19, %s2459_s16 }
  0x6a   : > { %1393 = vperm.xlu1 %2412, %v1385_v1   ;;  %1388 = vperm.xlu0 %2411, %v1384_v11   ;;  %v2992_v1 = vmul.f32 %v2681_v15, %v2678_v14  ;;  %p2461_p9 = pnand %p2460_p6, %p2612_p5 }
  0x6b   : > { %p2468_p13 = por %p2467_p12, %p2466_p11 }
  0x6c   : > { %v976_v13 = vrot.slane %v2992_v1, %v2650_v4  ;;  %p2462_p10 = pneg %p2461_p9 }
  0x6e   : > { %1632 = vperm.xlu1 %2412, %v1616_v5   ;;  %v980_v5 = vrot.slane %v2992_v1, %v2699_v19  ;;  %p2469_p0 = pnand %p2468_p13, %p2462_p10 }
  0x72   : > { %1712 = vperm.xlu1 %2412, %v1695_v6   ;;  %v950_v6 = vrot.slane %v2678_v14, %v2699_v19 }
  0x76   : > { %1793 = vperm.xlu1 %2412, %v1776_v9  }
  0x9c   : > { %v679_v11 = vpop.permute.xlu1 %678  ;;  %v625_v18 = vpop.permute.xlu0 %624 }
  0xa0   : > { %v3000_v9 = vpop.permute.xlu1 %680  ;;  %v3002_v0 = vpop.permute.xlu0 %626 }
  0xa1   : > { %v683_v58 = vsel %vm682_vm6, %v679_v11, %v3000_v9  ;;  %v629_v12 = vsel %vm628_vm7, %v625_v18, %v3002_v0 }
  0xa2   : > { %v712_v48 = vmul.f32 %v704_v27, %v683_v58  ;;  %v991_v2 = vmul.f32 %v980_v5, %v683_v58  ;;  %v1319_v61 = vmul.f32 %v1305_v28, %v683_v58  ;;  %v657_v62 = vmul.f32 %v649_v23, %v629_v12 }
  0xa3   : > { %v961_v57 = vmul.f32 %v950_v6, %v629_v12  ;;  %v1277_v56 = vmul.f32 %v1263_v24, %v629_v12  ;;  %v879_v23 = vrot.slane %v2681_v15, %v2699_v19 }
  0xa4   : > { %716 = vst [vmem:[#allocation2 + $0x140] sm:$0xf] %v712_v48  ;;  %v999_v54 = vrot.slane %v991_v2, 4  ;;  %1323 = vst [vmem:[#allocation2 + $0xf0] sm:$0xf] %v1319_v61  ;;  %v665_v27 = vrot.slane %v657_v62, 4  ;;  %v3026_v5 = vpop.permute.xlu1 %676  ;;  %v3028_v53 = vpop.permute.xlu0 %622  ;;  %v3041_v61 = vmul.f32 %v2740_v33, %v2678_v14 }
  0xa5   : > { %965 = vst [vmem:[#allocation2 + $0x148] sm:$0xf] %v961_v57  ;;  %v1285_v28 = vrot.slane %v1277_v56, 4  ;;  %v684_v24 = vsel %vm682_vm6, %v3026_v5, %v679_v11  ;;  %v630_v2 = vsel %vm628_vm7, %v3028_v53, %v625_v18 }
  0xa6   : > { %1007 = vst [vmem:[#allocation2 + $0x148] sm:$0xf0] %v999_v54  ;;  %673 = vst [vmem:[#allocation2 + $0x60] sm:$0xf0] %v665_v27  ;;  %v711_v62 = vmul.f32 %v700_v29, %v684_v24  ;;  %v990_v57 = vmul.f32 %v976_v13, %v684_v24  ;;  %v1318_v56 = vmul.f32 %v1301_v30, %v684_v24 }
  0xa7   : > { %v656_v48 = vmul.f32 %v645_v25, %v630_v2  ;;  %1293 = vst [vmem:[#allocation2 + $0x38] sm:$0xf0] %v1285_v28  ;;  %v960_v12 = vmul.f32 %v946_v55, %v630_v2  ;;  %v1276_v54 = vmul.f32 %v1259_v26, %v630_v2  ;;  %v909_v6 = vrot.slane %v3041_v61, %v2699_v19 }
  0xa8   : > { %715 = vst [vmem:[#allocation2 + $0x138] sm:$0xf] %v711_v62  ;;  %v998_v58 = vrot.slane %v990_v57, 4  ;;  %1322 = vst [vmem:[#allocation2 + $0x58] sm:$0xf] %v1318_v56  ;;  %v3055_v29 = vpop.permute.xlu1 %527  ;;  %v526_v13 = vpop.permute.xlu0 %525  ;;  %v905_v56 = vrot.slane %v3041_v61, %v2650_v4 }
  0xa9   : > { %v664_v11 = vrot.slane %v656_v48, 4  ;;  %964 = vst [vmem:[#allocation2 + $0x68] sm:$0xf] %v960_v12  ;;  %v1284_v18 = vrot.slane %v1276_v54, 4  ;;  %v530_v30 = vsel %vm529_vm8, %v526_v13, %v3055_v29  ;;  %v875_v12 = vrot.slane %v2681_v15, %v2650_v4 }
  0xaa   : > { %1006 = vst [vmem:[#allocation2 + $0x68] sm:$0xf0] %v998_v58  ;;  %v559_v25 = vmul.f32 %v551_v31, %v530_v30  ;;  %v890_v26 = vmul.f32 %v879_v23, %v530_v30  ;;  %v1205_v55 = vmul.f32 %v1191_v35, %v530_v30 }
  0xab   : > { %672 = vst [vmem:[#allocation2 + $0x108] sm:$0xf0] %v664_v11  ;;  %1292 = vst [vmem:[#allocation2 + $0x128] sm:$0xf0] %v1284_v18  ;;  %v1381_v27 = vld [vmem:[#allocation2 + $0xf0] sm:$0xf]  ;;  %v842_v18 = vrot.slane %v2740_v33, %v2699_v19 }
  0xac   : > { %v567_v28 = vrot.slane %v559_v25, 4  ;;  %894 = vst [vmem:[#allocation2 + $0x178] sm:$0xf] %v890_v26  ;;  %v1213_v24 = vrot.slane %v1205_v55, 4  ;;  %2334 = vmatprep.subr.msk.mxu0 %vm1403_vm9, %v1381_v27  ;;  %v3070_v2 = vpop.permute.xlu1 %582  ;;  %v581_v62 = vpop.permute.xlu0 %580 }
  0xad   : > { %v585_v31 = vsel %vm584_vm10, %v581_v62, %v3070_v2 }
  0xae   : > { %575 = vst [vmem:[#allocation2 + $0x98] sm:$0xf0] %v567_v28  ;;  %1221 = vst [vmem:[#allocation2 + $0x78] sm:$0xf0] %v1213_v24  ;;  %v615_v35 = vmul.f32 %v607_v41, %v585_v31  ;;  %v920_v23 = vmul.f32 %v909_v6, %v585_v31  ;;  %v1248_v57 = vmul.f32 %v1234_v42, %v585_v31 }
  0xaf   : > { %v1380_v48 = vld [vmem:[#allocation2 + $0x58] sm:$0xf] }
  0xb0   : > { %619 = vst [vmem:[#allocation2 + $0x60] sm:$0xf] %v615_v35  ;;  %v928_v54 = vrot.slane %v920_v23, 4  ;;  %1252 = vst [vmem:[#allocation2 + $0x38] sm:$0xf] %v1248_v57  ;;  %2335 = vmatpush1.msk.msra.mxu0 %vm1403_vm9, %v1380_v48  ;;  %v3086_v58 = vpop.permute.xlu1 %578  ;;  %v3088_v41 = vpop.permute.xlu0 %523  ;;  %v984_v23 = vrot.slane %v2992_v1, %v2656_v8 }
  0xb1   : > { %v586_v42 = vsel %vm584_vm10, %v3086_v58, %v581_v62  ;;  %v531_v11 = vsel %vm529_vm8, %v3088_v41, %v526_v13 }
  0xb2   : > { %936 = vst [vmem:[#allocation2 + $0x178] sm:$0xf0] %v928_v54  ;;  %v614_v30 = vmul.f32 %v603_v43, %v586_v42  ;;  %v919_v25 = vmul.f32 %v905_v56, %v586_v42  ;;  %v1247_v26 = vmul.f32 %v1230_v44, %v586_v42  ;;  %v558_v55 = vmul.f32 %v547_v34, %v531_v11 }
  0xb3   : > { %v889_v13 = vmul.f32 %v875_v12, %v531_v11  ;;  %v1204_v6 = vmul.f32 %v1187_v39, %v531_v11  ;;  %v972_v34 = vrot.slane %v2992_v1, %v2648_v3  ;;  %v942_v56 = vrot.slane %v2678_v14, %v2648_v3 }
  0xb4   : > { %618 = vst [vmem:[#allocation2 + $0x108] sm:$0xf] %v614_v30  ;;  %v927_v27 = vrot.slane %v919_v25, 4  ;;  %1251 = vst [vmem:[#allocation2 + $0x128] sm:$0xf] %v1247_v26  ;;  %v566_v28 = vrot.slane %v558_v55, 4  ;;  %v3111_v24 = vpop.permute.xlu1 %441  ;;  %v440_v43 = vpop.permute.xlu0 %439  ;;  %v3941_v26 = vrot.slane %v2711_v22, %v2699_v19  ;;  %v3942_v55 = vrot.slane %v2711_v22, %v2656_v8 }
  0xb5   : > { %893 = vst [vmem:[#allocation2 + $0xc0] sm:$0xf] %v889_v13  ;;  %v1212_v62 = vrot.slane %v1204_v6, 4  ;;  %v447_v44 = vsel %vm445_vm11, %v440_v43, %v3111_v24  ;;  %v3943_v13 = vrot.slane %v2685_v16, %v2648_v3 }
  0xb6   : > { %935 = vst [vmem:[#allocation2 + $0xc0] sm:$0xf0] %v927_v27  ;;  %574 = vst [vmem:[#allocation2 + $0x118] sm:$0xf0] %v566_v28  ;;  %v475_v39 = vmul.f32 %v467_v45, %v447_v44  ;;  %v853_v31 = vmul.f32 %v842_v18, %v447_v44  ;;  %v1134_v35 = vmul.f32 %v1120_v52, %v447_v44 }
  0xb7   : > { %1220 = vst [vmem:[#allocation2 + $0x70] sm:$0xf0] %v1212_v62  ;;  %v1377_v57 = vld [vmem:[#allocation2 + $0x38] sm:$0xff]  ;;  %v954_v45 = vrot.slane %v2678_v14, %v2656_v8  ;;  %v838_v52 = vrot.slane %v2740_v33, %v2650_v4 }
  0xb8   : > { %v483_v48 = vrot.slane %v475_v39, 4  ;;  %857 = vst [vmem:[#allocation2 + $0x190] sm:$0xf] %v853_v31  ;;  %v1142_v12 = vrot.slane %v1134_v35, 4  ;;  %v675_v54 = vpop.permute.xlu1 %674  ;;  %1422 = vmatprep.subr.mxu0 %v1377_v57  ;;  %v621_v42 = vpop.permute.xlu0 %620  ;;  %v1373_v39 = vld [vmem:[#allocation2 + $0x78] sm:$0xff]  ;;  %v3946_v57 = vrot.slane %v2689_v17, %v2656_v8 }
  0xb9   : > { %v685_v1 = vsel %vm682_vm6, %v675_v54, %v3026_v5  ;;  %v686_v11 = vsel %vm682_vm6, %v3000_v9, %v675_v54  ;;  %v631_v18 = vsel %vm628_vm7, %v621_v42, %v3028_v53  ;;  %v632_v14 = vsel %vm628_vm7, %v3002_v0, %v621_v42 }
  0xba   : > { %491 = vst [vmem:[#allocation2 + $0x48] sm:$0xf0] %v483_v48  ;;  %1150 = vst [vmem:[#allocation2 + $0x100] sm:$0xf0] %v1142_v12  ;;  %v709_v30 = vmul.f32 %v692_v49, %v686_v11  ;;  %v710_v5 = vmul.f32 %v696_v50, %v685_v1  ;;  %v989_v25 = vmul.f32 %v972_v34, %v685_v1 }
  0xbb   : > { %v992_v9 = vmul.f32 %v984_v23, %v686_v11  ;;  %v1320_v53 = vmul.f32 %v3941_v26, %v686_v11  ;;  %v1321_v0 = vmul.f32 %v3942_v55, %v685_v1  ;;  %v654_v6 = vmul.f32 %v3943_v13, %v632_v14  ;;  %v1376_v21 = vld [vmem:[#allocation2 + $0x128] sm:$0xff] }
  0xbc   : > { %v3944_v49 = vrot.slane %v2685_v16, %v2650_v4  ;;  %713 = vst [vmem:[#allocation2 + $0xe0] sm:$0xf] %v709_v30  ;;  %714 = vst [vmem:[#allocation2 + $0x188] sm:$0xf] %v710_v5  ;;  %v997_v50 = vrot.slane %v989_v25, 4  ;;  %v959_v62 = vmul.f32 %v942_v56, %v631_v18  ;;  %v962_v44 = vmul.f32 %v954_v45, %v632_v14  ;;  %v3162_v34 = vpop.permute.xlu1 %342  ;;  %v3164_v22 = vpop.permute.xlu0 %437 }
  0xbd   : > { %v1000_v28 = vrot.slane %v992_v9, 4  ;;  %1423 = vmatpush1.msra.mxu0 %v1376_v21  ;;  %1324 = vst [vmem:[#allocation2 + $0x30] sm:$0xf] %v1320_v53  ;;  %1325 = vst [vmem:[#allocation2 + $0x198] sm:$0xf] %v1321_v0  ;;  %v662_v31 = vrot.slane %v654_v6, 4  ;;  %v3945_v16 = vrot.slane %v2689_v17, %v2699_v19  ;;  %v1279_v48 = vmul.f32 %v3946_v57, %v631_v18 }
  0xbe   : > { %v655_v27 = vmul.f32 %v3944_v49, %v631_v18  ;;  %1424 = vmatprep.subr.mxu0 %v1373_v39  ;;  %1005 = vst [vmem:[#allocation2] sm:$0xf0] %v997_v50  ;;  %963 = vst [vmem:[#allocation2] sm:$0xf] %v959_v62  ;;  %v448_v56 = vsel %vm445_vm11, %v3164_v22, %v440_v43  ;;  %v1372_v12 = vld [vmem:[#allocation2 + $0x70] sm:$0xff]  ;;  %v771_v54 = vrot.slane %v2823_v7, %v2699_v19 }
  0xbf   : > { %v1278_v23 = vmul.f32 %v3945_v16, %v632_v14  ;;  %1008 = vst [vmem:[#allocation2 + $0x8] sm:$0xf0] %v1000_v28  ;;  %966 = vst [vmem:[#allocation2 + $0x8] sm:$0xf] %v962_v44  ;;  %v3180_v45 = vmul.f32 %v2681_v15, %v2823_v7  ;;  %v1287_v42 = vrot.slane %v1279_v48, 4  ;;  %v3947_v1 = vrot.slane %v2760_v40, %v2699_v19 }
  0xc0   : > { %v663_v35 = vrot.slane %v655_v27, 4  ;;  %670 = vst [vmem:[#allocation2 + $0x120] sm:$0xf0] %v662_v31  ;;  %v852_v18 = vmul.f32 %v838_v52, %v448_v56  ;;  %1425 = vmatpush1.msra.mxu0 %v1372_v12  ;;  %v3948_v43 = vrot.slane %v2778_v46, %v2648_v3  ;;  %v3188_v30 = vpop.permute.xlu1 %396  ;;  %v3190_v5 = vpop.permute.xlu0 %344  ;;  %v871_v25 = vrot.slane %v2681_v15, %v2648_v3 }
  0xc1   : > { %v1286_v17 = vrot.slane %v1278_v23, 4  ;;  %v474_v11 = vmul.f32 %v3947_v1, %v448_v56  ;;  %1295 = vst [vmem:[#allocation2 + $0x170] sm:$0xf0] %v1287_v42  ;;  %v350_v52 = vsel %vm348_vm12, %v3162_v34, %v3190_v5  ;;  %v883_v26 = vrot.slane %v2681_v15, %v2656_v8 }
  0xc2   : > { %671 = vst [vmem:[#allocation2 + $0x150] sm:$0xf0] %v663_v35  ;;  %v1133_v14 = vmul.f32 %v3948_v43, %v448_v56  ;;  %856 = vst [vmem:[#allocation2 + $0xf8] sm:$0xf] %v852_v18  ;;  %v3949_v55 = vrot.slane %v2828_v38, %v2656_v8  ;;  %v782_v13 = vmul.f32 %v771_v54, %v350_v52 }
  0xc3   : > { %1294 = vst [vmem:[#allocation2 + $0x88] sm:$0xf0] %v1286_v17  ;;  %v482_v9 = vrot.slane %v474_v11, 4  ;;  %v3950_v6 = vrot.slane %v2832_v47, %v2650_v4  ;;  %v801_v27 = vrot.slane %v3180_v45, %v2699_v19  ;;  %v767_v21 = vrot.slane %v2823_v7, %v2650_v4 }
  0xc4   : > { %v1141_v53 = vrot.slane %v1133_v14, 4  ;;  %v377_v0 = vmul.f32 %v3949_v55, %v350_v52  ;;  %v901_v15 = vrot.slane %v3041_v61, %v2648_v3  ;;  %v913_v50 = vrot.slane %v3041_v61, %v2656_v8  ;;  %786 = vst [vmem:[#allocation2 + $0x1b8] sm:$0xf] %v782_v13  ;;  %v1383_v44 = vld [vmem:[#allocation2 + $0x198] sm:$0xf]  ;;  %v522_v39 = vpop.permute.xlu1 %521  ;;  %v3215_v31 = vpop.permute.xlu0 %398 }
  0xc5   : > { %v1062_v49 = vmul.f32 %v3950_v6, %v350_v52  ;;  %490 = vst [vmem:[#allocation2 + $0x130] sm:$0xf0] %v482_v9  ;;  %v1382_v35 = vld [vmem:[#allocation2 + $0x30] sm:$0xf]  ;;  %v797_v16 = vrot.slane %v3180_v45, %v2650_v4  ;;  %v3221_v23 = vmul.f32 %v2740_v33, %v2823_v7  ;;  %2338 = vmatprep.subr.msk.mxu1 %vm1403_vm9, %v1383_v44 }
  0xc6   : > { %1149 = vst [vmem:[#allocation2 + $0x10] sm:$0xf0] %v1141_v53  ;;  %v385_v28 = vrot.slane %v377_v0, 4  ;;  %v532_v61 = vsel %vm529_vm8, %v522_v39, %v3088_v41  ;;  %v533_v57 = vsel %vm529_vm8, %v3055_v29, %v522_v39  ;;  %v404_v48 = vsel %vm402_vm13, %v3188_v30, %v3215_v31  ;;  %2339 = vmatpush1.msk.msra.mxu1 %vm1403_vm9, %v1382_v35 }
  0xc7   : > { %v1070_v62 = vrot.slane %v1062_v49, 4  ;;  %v834_v56 = vrot.slane %v2740_v33, %v2648_v3  ;;  %v3951_v12 = vrot.slane %v2703_v20, %v2648_v3  ;;  %v3952_v41 = vrot.slane %v2703_v20, %v2650_v4 }
  0xc8   : > { %393 = vst [vmem:[#allocation2 + $0x18] sm:$0xf0] %v385_v28  ;;  %v888_v42 = vmul.f32 %v871_v25, %v532_v61  ;;  %v891_v29 = vmul.f32 %v883_v26, %v533_v57  ;;  %v3953_v1 = vrot.slane %v2737_v32, %v2699_v19  ;;  %v3954_v18 = vrot.slane %v2737_v32, %v2656_v8  ;;  %v3255_v55 = vpop.permute.xlu1 %340  ;;  %v577_v0 = vpop.permute.xlu0 %576 }
  0xc9   : > { %1078 = vst [vmem:[#allocation2 + $0xa8] sm:$0xf0] %v1070_v62  ;;  %v556_v54 = vmul.f32 %v3951_v12, %v533_v57  ;;  %v557_v17 = vmul.f32 %v3952_v41, %v532_v61  ;;  %v3955_v14 = vrot.slane %v2844_v51, %v2656_v8  ;;  %v812_v52 = vmul.f32 %v801_v27, %v404_v48 }
  0xca   : > { %v1206_v11 = vmul.f32 %v3953_v1, %v533_v57  ;;  %v1207_v43 = vmul.f32 %v3954_v18, %v532_v61  ;;  %892 = vst [vmem:[#allocation2 + $0x90] sm:$0xf] %v888_v42  ;;  %895 = vst [vmem:[#allocation2 + $0xc8] sm:$0xf] %v891_v29  ;;  %v3956_v25 = vrot.slane %v2848_v59, %v2650_v4 }
  0xcb   : > { %v432_v9 = vmul.f32 %v3955_v14, %v404_v48  ;;  %v564_v53 = vrot.slane %v556_v54, 4  ;;  %v565_v20 = vrot.slane %v557_v17, 4  ;;  %v846_v32 = vrot.slane %v2740_v33, %v2656_v8 }
  0xcc   : > { %v1104_v26 = vmul.f32 %v3956_v25, %v404_v48  ;;  %v1214_v13 = vrot.slane %v1206_v11, 4  ;;  %v1215_v6 = vrot.slane %v1207_v43, 4  ;;  %v820_v49 = vrot.slane %v812_v52, 4  ;;  %v3284_v1 = vpop.permute.xlu1 %296 }
  0xcd   : > { %436 = vst [vmem:[#allocation2 + $0x48] sm:$0xf] %v432_v9  ;;  %v351_v27 = vsel %vm348_vm12, %v3255_v55, %v3162_v34  ;;  %572 = vst [vmem:[#allocation2 + $0x180] sm:$0xf0] %v564_v53  ;;  %v3957_v28 = vrot.slane %v2828_v38, %v2699_v19  ;;  %v3958_v39 = vrot.slane %v2832_v47, %v2648_v3 }
  0xce   : > { %573 = vst [vmem:[#allocation2 + $0x110] sm:$0xf0] %v565_v20  ;;  %1108 = vst [vmem:[#allocation2 + $0x100] sm:$0xf] %v1104_v26  ;;  %v781_v44 = vmul.f32 %v767_v21, %v351_v27  ;;  %v587_v61 = vsel %vm584_vm10, %v577_v0, %v3086_v58  ;;  %v588_v34 = vsel %vm584_vm10, %v3070_v2, %v577_v0  ;;  %v3286_v2 = vpop.permute.xlu0 %394 }
  0xcf   : > { %v376_v62 = vmul.f32 %v3957_v28, %v351_v27  ;;  %v1061_v35 = vmul.f32 %v3958_v39, %v351_v27  ;;  %1222 = vst [vmem:[#allocation2 + $0xa0] sm:$0xf0] %v1214_v13  ;;  %1223 = vst [vmem:[#allocation2 + $0x158] sm:$0xf0] %v1215_v6  ;;  %v3959_v57 = vrot.slane %v2748_v36, %v2650_v4 }
  0xd0   : > { %828 = vst [vmem:[#allocation2 + $0x1b8] sm:$0xf0] %v820_v49  ;;  %v918_v21 = vmul.f32 %v901_v15, %v587_v61  ;;  %v3960_v12 = vrot.slane %v2752_v37, %v2656_v8  ;;  %785 = vst [vmem:[#allocation2 + $0x1a8] sm:$0xf] %v781_v44  ;;  %v3961_v58 = vrot.slane %v2748_v36, %v2648_v3 }
  0xd1   : > { %v613_v48 = vmul.f32 %v3959_v57, %v587_v61  ;;  %v384_v41 = vrot.slane %v376_v62, 4  ;;  %v1069_v17 = vrot.slane %v1061_v35, 4  ;;  %v921_v29 = vmul.f32 %v913_v50, %v588_v34 }
  0xd2   : > { %v1250_v54 = vmul.f32 %v3960_v12, %v587_v61  ;;  %v612_v42 = vmul.f32 %v3961_v58, %v588_v34  ;;  %v926_v11 = vrot.slane %v918_v21, 4  ;;  %v3962_v15 = vrot.slane %v2752_v37, %v2699_v19  ;;  %v3311_v26 = vpop.permute.xlu0 %298 }
  0xd3   : > { %617 = vst [vmem:[#allocation2 + $0x150] sm:$0xf] %v613_v48  ;;  %v405_v43 = vsel %vm402_vm13, %v3286_v2, %v3188_v30  ;;  %392 = vst [vmem:[#allocation2 + $0xd8] sm:$0xf0] %v384_v41  ;;  %v929_v36 = vrot.slane %v921_v29, 4  ;;  %v3963_v50 = vrot.slane %v2844_v51, %v2699_v19  ;;  %v3964_v9 = vrot.slane %v2848_v59, %v2648_v3 }
  0xd4   : > { %v1249_v18 = vmul.f32 %v3962_v15, %v588_v34  ;;  %1254 = vst [vmem:[#allocation2 + $0x170] sm:$0xf] %v1250_v54  ;;  %1077 = vst [vmem:[#allocation2 + $0x40] sm:$0xf0] %v1069_v17  ;;  %v811_v37 = vmul.f32 %v797_v16, %v405_v43  ;;  %v730_v30 = vrot.slane %v3221_v23, %v2699_v19  ;;  %v444_v16 = vpop.permute.xlu1 %443 }
  0xd5   : > { %616 = vst [vmem:[#allocation2 + $0x120] sm:$0xf] %v612_v42  ;;  %v431_v14 = vmul.f32 %v3963_v50, %v405_v43  ;;  %v1103_v52 = vmul.f32 %v3964_v9, %v405_v43  ;;  %934 = vst [vmem:[#allocation2 + $0x90] sm:$0xf0] %v926_v11  ;;  %v763_v53 = vrot.slane %v2823_v7, %v2648_v3  ;;  %v1369_v28 = vld [vmem:[#allocation2 + $0x100] sm:$0xff] }
  0xd6   : > { %1253 = vst [vmem:[#allocation2 + $0x88] sm:$0xf] %v1249_v18  ;;  %v775_v20 = vrot.slane %v2823_v7, %v2656_v8  ;;  %937 = vst [vmem:[#allocation2 + $0xc8] sm:$0xf0] %v929_v36  ;;  %v819_v25 = vrot.slane %v811_v37, 4  ;;  %v726_v0 = vrot.slane %v3221_v23, %v2650_v4  ;;  %v722_v13 = vrot.slane %v3221_v23, %v2648_v3  ;;  %v295_v42 = vpop.permute.xlu0 %294 }
  0xd7   : > { %435 = vst [vmem:[#allocation2 + $0x130] sm:$0xf] %v431_v14  ;;  %1107 = vst [vmem:[#allocation2 + $0x10] sm:$0xf] %v1103_v52  ;;  %v734_v6 = vrot.slane %v3221_v23, %v2656_v8  ;;  %v446_v7 = vsel %vm445_vm11, %v3111_v24, %v444_v16  ;;  %v449_v49 = vsel %vm445_vm11, %v444_v16, %v3164_v22  ;;  %1426 = vmatprep.subr.mxu0 %v1369_v28 }
  0xd8   : > { %v306_v27 = vsel %vm304_vm14, %v3284_v1, %v3311_v26  ;;  %v793_v62 = vrot.slane %v3180_v45, %v2648_v3  ;;  %827 = vst [vmem:[#allocation2 + $0x1a8] sm:$0xf0] %v819_v25  ;;  %v3965_v44 = vrot.slane %v2760_v40, %v2648_v3  ;;  %v3966_v24 = vrot.slane %v2760_v40, %v2650_v4  ;;  %v347_v17 = vpop.permute.xlu1 %346 }
  0xd9   : > { %v851_v22 = vmul.f32 %v834_v56, %v449_v49  ;;  %v854_v61 = vmul.f32 %v846_v32, %v446_v7  ;;  %v3967_v34 = vrot.slane %v2778_v46, %v2699_v19  ;;  %v3968_v48 = vrot.slane %v2778_v46, %v2656_v8 }
  0xda   : > { %v472_v39 = vmul.f32 %v3965_v44, %v446_v7  ;;  %v473_v35 = vmul.f32 %v3966_v24, %v449_v49  ;;  %v3969_v40 = vrot.slane %v2904_v10, %v2656_v8  ;;  %v741_v54 = vmul.f32 %v730_v30, %v306_v27 }
  0xdb   : > { %v1135_v57 = vmul.f32 %v3967_v34, %v446_v7  ;;  %v1136_v21 = vmul.f32 %v3968_v48, %v449_v49  ;;  %855 = vst [vmem:[#allocation2 + $0xe8] sm:$0xf] %v851_v22  ;;  %858 = vst [vmem:[#allocation2 + $0xb8] sm:$0xf] %v854_v61  ;;  %v3970_v33 = vrot.slane %v2908_v60, %v2650_v4  ;;  %v1379_v58 = vld [vmem:[#allocation2 + $0x170] sm:$0xff]  ;;  %v1375_v7 = vld [vmem:[#allocation2 + $0x158] sm:$0xff]  ;;  %v401_v34 = vpop.permute.xlu0 %400 }
  0xdc   : > { %v335_v12 = vmul.f32 %v3969_v40, %v306_v27  ;;  %v480_v41 = vrot.slane %v472_v39, 4  ;;  %v481_v56 = vrot.slane %v473_v35, 4  ;;  %v805_v46 = vrot.slane %v3180_v45, %v2656_v8  ;;  %1499 = vmatprep.subr.mxu1 %v1379_v58  ;;  %v301_v24 = vpop.permute.xlu1 %300  ;;  %v1361_v45 = vld [vmem:[#allocation2 + $0x68] sm:$0xff] }
  0xdd   : > { %v1033_v32 = vmul.f32 %v3970_v33, %v306_v27  ;;  %v1143_v29 = vrot.slane %v1135_v57, 4  ;;  %v1144_v11 = vrot.slane %v1136_v21, 4  ;;  %v749_v15 = vrot.slane %v741_v54, 4  ;;  %v1378_v52 = vld [vmem:[#allocation2 + $0x88] sm:$0xff] }
  0xde   : > { %339 = vst [vmem:[#allocation2 + $0x18] sm:$0xf] %v335_v12  ;;  %v349_v18 = vsel %vm348_vm12, %v3190_v5, %v347_v17  ;;  %488 = vst [vmem:[#allocation2 + $0x50] sm:$0xf0] %v480_v41  ;;  %v352_v43 = vsel %vm348_vm12, %v347_v17, %v3255_v55  ;;  %v3971_v36 = vrot.slane %v2828_v38, %v2648_v3  ;;  %1500 = vmatpush1.msra.mxu1 %v1378_v52  ;;  %v1368_v49 = vld [vmem:[#allocation2 + $0x10] sm:$0xff]  ;;  %v1363_v52 = vld [vmem:[#allocation2 + $0x8] sm:$0xff] }
  0xdf   : > { %489 = vst [vmem:[#allocation2 + $0x168] sm:$0xf0] %v481_v56  ;;  %1037 = vst [vmem:[#allocation2 + $0xa8] sm:$0xf] %v1033_v32  ;;  %v783_v14 = vmul.f32 %v775_v20, %v349_v18  ;;  %v3972_v37 = vrot.slane %v2832_v47, %v2699_v19  ;;  %v3973_v5 = vrot.slane %v2828_v38, %v2650_v4  ;;  %1501 = vmatprep.subr.mxu1 %v1375_v7  ;;  %v1340_v7 = vld [vmem:[#allocation2 + $0x120] sm:$0xff] }
  0xe0   : > { %v374_v50 = vmul.f32 %v3971_v36, %v349_v18  ;;  %1151 = vst [vmem:[#allocation2 + $0x160] sm:$0xf0] %v1143_v29  ;;  %1152 = vst [vmem:[#allocation2 + $0x20] sm:$0xf0] %v1144_v11  ;;  %v780_v25 = vmul.f32 %v763_v53, %v352_v43  ;;  %v3974_v55 = vrot.slane %v2832_v47, %v2656_v8  ;;  %v1374_v53 = vld [vmem:[#allocation2 + $0xa0] sm:$0xff]  ;;  %1427 = vmatpush1.msra.mxu0 %v1368_v49 }
  0xe1   : > { %v1063_v9 = vmul.f32 %v3972_v37, %v349_v18  ;;  %757 = vst [vmem:[#allocation2 + $0x138] sm:$0xf0] %v749_v15  ;;  %v375_v30 = vmul.f32 %v3973_v5, %v352_v43  ;;  %v307_v20 = vsel %vm304_vm14, %v295_v42, %v3284_v1  ;;  %787 = vst [vmem:[#allocation2 + $0x28] sm:$0xf] %v783_v14  ;;  %1502 = vmatpush1.msra.mxu1 %v1374_v53  ;;  %v1349_v14 = vld [vmem:[#allocation2 + $0x1a8] sm:$0xff]  ;;  %v1350_v53 = vld [vmem:[#allocation2 + $0x1b8] sm:$0xff] }
  0xe2   : > { %v1064_v16 = vmul.f32 %v3974_v55, %v352_v43  ;;  %v382_v27 = vrot.slane %v374_v50, 4  ;;  %v3975_v44 = vrot.slane %v2904_v10, %v2699_v19  ;;  %v740_v39 = vmul.f32 %v726_v0, %v307_v20  ;;  %784 = vst [vmem:[#allocation2 + $0x80] sm:$0xf] %v780_v25  ;;  %v1352_v36 = vld [vmem:[#allocation2 + $0xe8] sm:$0xff]  ;;  %v1355_v49 = vld [vmem:[#allocation2 + $0xb8] sm:$0xff] }
  0xe3   : > { %v1071_v28 = vrot.slane %v1063_v9, 4  ;;  %v383_v47 = vrot.slane %v375_v30, 4  ;;  %v3976_v1 = vrot.slane %v2908_v60, %v2648_v3  ;;  %v305_v61 = vsel %vm304_vm14, %v3311_v26, %v301_v24  ;;  %v1362_v30 = vld [vmem:[#allocation2 + $0x148] sm:$0xff] }
  0xe4   : > { %v334_v38 = vmul.f32 %v3975_v44, %v307_v20  ;;  %v1072_v35 = vrot.slane %v1064_v16, 4  ;;  %390 = vst [vmem:[#allocation2 + $0xb0] sm:$0xf0] %v382_v27  ;;  %v748_v0 = vrot.slane %v740_v39, 4  ;;  %v308_v57 = vsel %vm304_vm14, %v301_v24, %v295_v42  ;;  %v1359_v55 = vld [vmem:[#allocation2 + $0xc8] sm:$0xff]  ;;  %v1341_v16 = vld [vmem:[#allocation2 + $0x150] sm:$0xff] }
  0xe5   : > { %v1032_v22 = vmul.f32 %v3976_v1, %v307_v20  ;;  %1079 = vst [vmem:[#allocation2 + $0xd0] sm:$0xf0] %v1071_v28  ;;  %v3977_v48 = vrot.slane %v2904_v10, %v2648_v3  ;;  %v742_v40 = vmul.f32 %v734_v6, %v305_v61  ;;  %391 = vst [vmem:[#allocation2 + $0x1b0] sm:$0xf0] %v383_v47  ;;  %v1358_v20 = vld [vmem:[#allocation2 + $0x178] sm:$0xff]  ;;  %v1337_v27 = vld [vmem:[#allocation2 + $0x110] sm:$0xff] }
  0xe6   : > { %338 = vst [vmem:[#allocation2 + $0xd8] sm:$0xf] %v334_v38  ;;  %1080 = vst [vmem:[#allocation2 + $0x1a0] sm:$0xf0] %v1072_v35  ;;  %v3978_v26 = vrot.slane %v2904_v10, %v2650_v4  ;;  %v739_v54 = vmul.f32 %v722_v13, %v308_v57  ;;  %v3979_v41 = vrot.slane %v2908_v60, %v2699_v19  ;;  %v1365_v29 = vld [vmem:[#allocation2 + $0xa8] sm:$0xff]  ;;  %v1354_v28 = vld [vmem:[#allocation2 + $0x190] sm:$0xff] }
  0xe7   : > { %v332_v21 = vmul.f32 %v3977_v48, %v305_v61  ;;  %1036 = vst [vmem:[#allocation2 + $0x40] sm:$0xf] %v1032_v22  ;;  %v3980_v33 = vrot.slane %v2908_v60, %v2656_v8  ;;  %756 = vst [vmem:[#allocation2 + $0x188] sm:$0xf0] %v748_v0  ;;  %v750_v6 = vrot.slane %v742_v40, 4  ;;  %v403_v10 = vsel %vm402_vm13, %v3215_v31, %v401_v34  ;;  %v1336_v44 = vld [vmem:[#allocation2 + $0x180] sm:$0xff] }
  0xe8   : > { %v333_v12 = vmul.f32 %v3978_v26, %v308_v57  ;;  %v1034_v56 = vmul.f32 %v3979_v41, %v305_v61  ;;  %v406_v23 = vsel %vm402_vm13, %v401_v34, %v3286_v2  ;;  %v747_v13 = vrot.slane %v739_v54, 4  ;;  %1428 = vmatprep.subr.mxu0 %v1365_v29  ;;  %v1326_v1 = vld [vmem:[%s3929_s1] sm:$0xff]  ;;  %v1346_v22 = vld [vmem:[#allocation2 + $0x138] sm:$0xff]  ;;  %v1342_v0 = vld [vmem:[#allocation2 + $0x108] sm:$0xff] }
  0xe9   : > { %v1035_v32 = vmul.f32 %v3980_v33, %v308_v57  ;;  %336 = vst [vmem:[#allocation2 + $0xb0] sm:$0xf] %v332_v21  ;;  %v3981_v17 = vrot.slane %v2844_v51, %v2648_v3  ;;  %v3982_v58 = vrot.slane %v2844_v51, %v2650_v4  ;;  %v810_v31 = vmul.f32 %v793_v62, %v406_v23  ;;  %v1357_v62 = vld [vmem:[#allocation2 + $0xc0] sm:$0xff]  ;;  %v1339_v57 = vld [vmem:[#allocation2 + $0x98] sm:$0xff]  ;;  %v1327_v21 = vld [vmem:[%s3929_s1 + $0x8] sm:$0xff]  ;;  %v1389_v33 = vpop.permute.xlu0 %1388 }
  0xea   : > { %337 = vst [vmem:[#allocation2 + $0x1b0] sm:$0xf] %v333_v12  ;;  %1038 = vst [vmem:[#allocation2 + $0xd0] sm:$0xf] %v1034_v56  ;;  %v813_v63 = vmul.f32 %v805_v46, %v403_v10  ;;  %v3983_v2 = vrot.slane %v2848_v59, %v2699_v19  ;;  %v3984_v15 = vrot.slane %v2848_v59, %v2656_v8  ;;  %v1360_v19 = vld [vmem:[#allocation2] sm:$0xff]  ;;  %v1356_v8 = vld [vmem:[#allocation2 + $0x90] sm:$0xff] }
  0xeb   : > { %1039 = vst [vmem:[#allocation2 + $0x1a0] sm:$0xf] %v1035_v32  ;;  %v429_v60 = vmul.f32 %v3981_v17, %v403_v10  ;;  %v430_v42 = vmul.f32 %v3982_v58, %v406_v23  ;;  %758 = vst [vmem:[#allocation2 + $0x140] sm:$0xf0] %v750_v6  ;;  %v818_v3 = vrot.slane %v810_v31, 4  ;;  %v1353_v46 = vld [vmem:[#allocation2 + $0xf8] sm:$0xff] }
  0xec   : > { %v1105_v11 = vmul.f32 %v3983_v2, %v403_v10  ;;  %v1106_v18 = vmul.f32 %v3984_v15, %v406_v23  ;;  %755 = vst [vmem:[#allocation2 + $0xe0] sm:$0xf0] %v747_v13  ;;  %v821_v4 = vrot.slane %v813_v63, 4  ;;  %v1343_v34 = vld [vmem:[#allocation2 + $0x60] sm:$0xff]  ;;  %v3985_v48 = vmov 0.0   ;;  %v1338_v40 = vld [vmem:[#allocation2 + $0x118] sm:$0xff]  ;;  %v1394_v23 = vpop.permute.xlu1 %1393 }
  0xed   : > { %433 = vst [vmem:[#allocation2 + $0x50] sm:$0xf] %v429_v60  ;;  %434 = vst [vmem:[#allocation2 + $0x168] sm:$0xf] %v430_v42  ;;  %v1335_v26 = vld [vmem:[#allocation2 + $0x48] sm:$0xff]  ;;  %v1334_v12 = vld [vmem:[#allocation2 + $0x130] sm:$0xff] }
  0xee   : > { %1109 = vst [vmem:[#allocation2 + $0x160] sm:$0xf] %v1105_v11  ;;  %1110 = vst [vmem:[#allocation2 + $0x20] sm:$0xf] %v1106_v18  ;;  %v1364_v51 = vld [vmem:[#allocation2 + $0x40] sm:$0xff]  ;;  %v1345_v5 = vld [vmem:[#allocation2 + $0x188] sm:$0xff] }
  0xef   : > { %826 = vst [vmem:[#allocation2 + $0x80] sm:$0xf0] %v818_v3  ;;  %829 = vst [vmem:[#allocation2 + $0x28] sm:$0xf0] %v821_v4  ;;  %1429 = vmatpush1.msra.mxu0 %v1364_v51  ;;  %v1331_v54 = vld [vmem:[#allocation2 + $0x18] sm:$0xff] }
  0xf0   : > { %1430 = vmatprep.subr.mxu0 %v1361_v45  ;;  %v1328_v61 = vld [vmem:[#allocation2 + $0xb0] sm:$0xff]  ;;  %v1330_v41 = vld [vmem:[#allocation2 + $0xd8] sm:$0xff] }
  0xf1   : > { %1431 = vmatpush1.msra.mxu0 %v1360_v19  ;;  %v1366_v37 = vld [vmem:[#allocation2 + $0xd0] sm:$0xff] }
  0xf2   : > { %1432 = vmatprep.subr.mxu0 %v1357_v62  ;;  %v1367_v50 = vld [vmem:[#allocation2 + $0x1a0] sm:$0xff]  ;;  %v1329_v35 = vld [vmem:[#allocation2 + $0x1b0] sm:$0xff] }
  0xf3   : > { %1433 = vmatpush1.msra.mxu0 %v1356_v8  ;;  %v1344_v25 = vld [vmem:[#allocation2 + $0xe0] sm:$0xff] }
  0xf4   : > { %1434 = vmatprep.subr.mxu0 %v1353_v46  ;;  %v1333_v39 = vld [vmem:[#allocation2 + $0x168] sm:$0xff]  ;;  %v1332_v24 = vld [vmem:[#allocation2 + $0x50] sm:$0xff]  ;;  %v1347_v47 = vld [vmem:[#allocation2 + $0x140] sm:$0xff] }
  0xf5   : > { %v1371_v59 = vld [vmem:[#allocation2 + $0x20] sm:$0xff]  ;;  %1435 = vmatpush1.msra.mxu0 %v1352_v36 }
  0xf6   : > { %v1370_v43 = vld [vmem:[#allocation2 + $0x160] sm:$0xff]  ;;  %1503 = vmatprep.subr.mxu1 %v1371_v59  ;;  %1436 = vmatprep.subr.mxu0 %v1349_v14  ;;  %v1351_v38 = vld [vmem:[#allocation2 + $0x28] sm:$0xff] }
  0xf7   : > { %1504 = vmatpush1.msra.mxu1 %v1370_v43  ;;  %v1348_v9 = vld [vmem:[#allocation2 + $0x80] sm:$0xff] }
  0xf8   : > { %1505 = vmatprep.subr.mxu1 %v1367_v50  ;;  %1437 = vmatpush1.msra.mxu0 %v1348_v9 }
  0xf9   : > { %1506 = vmatpush1.msra.mxu1 %v1366_v37  ;;  %1438 = vmatprep.subr.mxu0 %v1345_v5 }
  0xfa   : > { %1507 = vmatprep.subr.mxu1 %v1363_v52  ;;  %1439 = vmatpush1.msra.mxu0 %v1344_v25 }
  0xfb   : > { %1508 = vmatpush1.msra.mxu1 %v1362_v30  ;;  %1440 = vmatprep.subr.mxu0 %v1341_v16 }
  0xfc   : > { %1509 = vmatprep.subr.mxu1 %v1359_v55  ;;  %1441 = vmatpush1.msra.mxu0 %v1340_v7 }
  0xfd   : > { %1510 = vmatpush1.msra.mxu1 %v1358_v20  ;;  %1442 = vmatprep.subr.mxu0 %v1337_v27 }
  0xfe   : > { %1511 = vmatprep.subr.mxu1 %v1355_v49  ;;  %1443 = vmatpush1.msra.mxu0 %v1336_v44 }
  0xff   : > { %1512 = vmatpush1.msra.mxu1 %v1354_v28  ;;  %1444 = vmatprep.subr.mxu0 %v1333_v39 }
 0x100   : > { %1513 = vmatprep.subr.mxu1 %v1351_v38  ;;  %1445 = vmatpush1.msra.mxu0 %v1332_v24 }
 0x101   : > { %1514 = vmatpush1.msra.mxu1 %v1350_v53  ;;  %1446 = vmatprep.subr.mxu0 %v1329_v35 }
 0x102   : > { %1515 = vmatprep.subr.mxu1 %v1347_v47  ;;  %1447 = vmatpush1.msra.mxu0 %v1328_v61 }
 0x103   : > { %1516 = vmatpush1.msra.mxu1 %v1346_v22  ;;  %2336 = vmatmul.mubr.msk.f32.vlgmr.msra.gmra.mxu0 %vm1396_vm15, %v1326_v1 }
 0x104   : > { %1517 = vmatprep.subr.mxu1 %v1343_v34  ;;  %1486 = vmatprep.mubr.f32.mxu0 %v3985_v48 }
 0x105   : > { %1518 = vmatpush1.msra.mxu1 %v1342_v0 }
 0x106   : > { %1519 = vmatprep.subr.mxu1 %v1339_v57 }
 0x107   : > { %1520 = vmatpush1.msra.mxu1 %v1338_v40  ;;  %2337 = vmatmul.mubr.msk.f32.gmra.mxu0 %vm1396_vm15, %v1327_v21 }
 0x108   : > { %1521 = vmatprep.subr.mxu1 %v1335_v26 }
 0x109   : > { %1522 = vmatpush1.msra.mxu1 %v1334_v12 }
 0x10a   : > { %1523 = vmatprep.subr.mxu1 %v1331_v54 }
 0x10b   : > { %1524 = vmatpush1.msra.mxu1 %v1330_v41 }
 0x10c   : > { %2340 = vmatmul.mubr.msk.f32.vlgmr.msra.gmra.mxu1 %vm1396_vm15, %v1326_v1 }
 0x10d   : > { %1563 = vmatprep.mubr.f32.mxu1 %v3985_v48 }
 0x110   : > { %2341 = vmatmul.mubr.msk.f32.gmra.mxu1 %vm1396_vm15, %v1327_v21 }
 0x1c3   : > { %v1482_v56 = vpop.f32.mrf.mxu0 }
 0x1c4   : > { %v3443_v6 = vadd.f32 %v1482_v56, %v1389_v33 }
 0x1c5   : > { %v1484_v32 = vpop.f32.mrf.mxu0 }
 0x1c6   : > { %v3445_v10 = vadd.f32 %v1484_v32, %v1389_v33  ;;  %v1571_v42 = vsel %vm1570_vm0, %v3443_v6, 0.0  ;;  %v1644_v63 = vsel %vm1643_vm1, %v3443_v6, 0.0  ;;  %v1725_v11 = vsel %vm1724_vm2, %v3443_v6, 0.0 }
 0x1c7   : > { %v1488_v13 = vpop.f32.mrf.mxu0  ;;  %v1806_v39 = vsel %vm1805_vm3, %v3443_v6, 0.0 }
 0x1c8   : > { %v3447_v17 = vadd.f32 %v1488_v13, %v1394_v23  ;;  %v1572_v31 = vsel %vm1570_vm0, %v3445_v10, 0.0  ;;  %v1645_v2 = vsel %vm1643_vm1, %v3445_v10, 0.0  ;;  %v1726_v4 = vsel %vm1724_vm2, %v3445_v10, 0.0 }
 0x1c9   : > { %v1490_v60 = vpop.f32.mrf.mxu0  ;;  %v1573_v45 = vadd.f32 %v1572_v31, %v1571_v42  ;;  %v1646_v14 = vadd.f32 %v1645_v2, %v1644_v63  ;;  %v1727_v37 = vadd.f32 %v1726_v4, %v1725_v11  ;;  %v1807_v53 = vsel %vm1805_vm3, %v3445_v10, 0.0  ;;  %v1857_v2 = vld [vmem:[%s3932_s4 + $0x6] sm:$0x3]  ;;  %v1615_v11 = vld [vmem:[%s3931_s3] sm:$0x3] }
 0x1ca   : > { %v3449_v58 = vadd.f32 %v1490_v60, %v1394_v23  ;;  %v1958_v18 = vsel %vm1643_vm1, %v3447_v17, 0.0  ;;  %v2038_v19 = vsel %vm1724_vm2, %v3447_v17, 0.0  ;;  %v1886_v5 = vsel %vm1570_vm0, %v3447_v17, 0.0  ;;  %v1856_v4 = vld [vmem:[%s3931_s3 + $0x6] sm:$0x3] }
 0x1cb   : > { %v2118_v1 = vsel %vm1805_vm3, %v3447_v17, 0.0  ;;  %v1808_v26 = vadd.f32 %v1807_v53, %v1806_v39 }
 0x1cc   : > { %v1559_v29 = vpop.f32.mrf.mxu1  ;;  %v1959_v3 = vsel %vm1643_vm1, %v3449_v58, 0.0  ;;  %v2039_v46 = vsel %vm1724_vm2, %v3449_v58, 0.0  ;;  %v1887_v30 = vsel %vm1570_vm0, %v3449_v58, 0.0  ;;  %v2119_v40 = vsel %vm1805_vm3, %v3449_v58, 0.0 }
 0x1cd   : > { %v3461_v15 = vadd.f32 %v1559_v29, %v1389_v33  ;;  %v1960_v50 = vadd.f32 %v1959_v3, %v1958_v18  ;;  %v2040_v20 = vadd.f32 %v2039_v46, %v2038_v19  ;;  %v1888_v35 = vadd.f32 %v1887_v30, %v1886_v5  ;;  %v1694_v18 = vld [vmem:[%s3931_s3 + $0x2] sm:$0x3]  ;;  %v1775_v3 = vld [vmem:[%s3931_s3 + $0x4] sm:$0x3] }
 0x1ce   : > { %v1561_v51 = vpop.f32.mrf.mxu1 }
 0x1cf   : > { %v3471_v62 = vadd.f32 %v1561_v51, %v1389_v33  ;;  %v1574_v8 = vsel %vm1570_vm0, %v3461_v15, 0.0  ;;  %v1647_v59 = vsel %vm1643_vm1, %v3461_v15, 0.0  ;;  %v1728_v7 = vsel %vm1724_vm2, %v3461_v15, 0.0  ;;  %v3538_v51 = vpop.permute.xlu1 %1632 }
 0x1d0   : > { %v1565_v43 = vpop.f32.mrf.mxu1  ;;  %v1575_v36 = vadd.f32 %v1574_v8, %v1573_v45  ;;  %v1648_v16 = vadd.f32 %v1647_v59, %v1646_v14  ;;  %v1729_v47 = vadd.f32 %v1728_v7, %v1727_v37  ;;  %v1809_v21 = vsel %vm1805_vm3, %v3461_v15, 0.0 }
 0x1d1   : > { %v3479_v9 = vadd.f32 %v1565_v43, %v1394_v23  ;;  %v1576_v52 = vsel %vm1570_vm0, %v3471_v62, 0.0  ;;  %v1649_v28 = vsel %vm1643_vm1, %v3471_v62, 0.0  ;;  %v1730_v0 = vsel %vm1724_vm2, %v3471_v62, 0.0 }
 0x1d2   : > { %v1567_v25 = vpop.f32.mrf.mxu1  ;;  %v1577_v55 = vadd.f32 %v1576_v52, %v1575_v36  ;;  %v1650_v61 = vadd.f32 %v1649_v28, %v1648_v16  ;;  %v1731_v12 = vadd.f32 %v1730_v0, %v1729_v47  ;;  %v1810_v56 = vadd.f32 %v1809_v21, %v1808_v26 }
 0x1d3   : > { %v3489_v49 = vadd.f32 %v1567_v25, %v1394_v23  ;;  %v1961_v27 = vsel %vm1643_vm1, %v3479_v9, 0.0  ;;  %v2041_v44 = vsel %vm1724_vm2, %v3479_v9, 0.0  ;;  %v1889_v48 = vsel %vm1570_vm0, %v3479_v9, 0.0  ;;  %v3540_v45 = vpop.permute.xlu1 %1712 }
 0x1d4   : > { %1578 = vadd.xlane.f32.xlu1 %v1577_v55  ;;  %v1962_v38 = vadd.f32 %v1961_v27, %v1960_v50  ;;  %v2042_v34 = vadd.f32 %v2041_v44, %v2040_v20  ;;  %v1890_v41 = vadd.f32 %v1889_v48, %v1888_v35  ;;  %v2120_v33 = vadd.f32 %v2119_v40, %v2118_v1 }
 0x1d5   : > { %v1963_v24 = vsel %vm1643_vm1, %v3489_v49, 0.0  ;;  %v2043_v57 = vsel %vm1724_vm2, %v3489_v49, 0.0  ;;  %v1891_v32 = vsel %vm1570_vm0, %v3489_v49, 0.0  ;;  %v1811_v23 = vsel %vm1805_vm3, %v3471_v62, 0.0 }
 0x1d6   : > { %v1964_v22 = vadd.f32 %v1963_v24, %v1962_v38  ;;  %v2044_v54 = vadd.f32 %v2043_v57, %v2042_v34  ;;  %v2121_v13 = vsel %vm1805_vm3, %v3479_v9, 0.0  ;;  %v1892_v60 = vadd.f32 %v1891_v32, %v1890_v41 }
 0x1d7   : > { %v1812_v42 = vadd.f32 %v1811_v23, %v1810_v56  ;;  %v2122_v31 = vadd.f32 %v2121_v13, %v2120_v33  ;;  %v2123_v29 = vsel %vm1805_vm3, %v3489_v49, 0.0  ;;  %v3542_v19 = vpop.permute.xlu1 %1793 }
 0x1d8   : > { %1965 = vadd.xlane.f32.xlu0 %v1964_v22  ;;  %1651 = vadd.xlane.f32.xlu1 %v1650_v61 }
 0x1d9   : > { %v2124_v63 = vadd.f32 %v2123_v29, %v2122_v31 }
 0x1dc   : > { %2045 = vadd.xlane.f32.xlu0 %v2044_v54  ;;  %1732 = vadd.xlane.f32.xlu1 %v1731_v12 }
 0x1e0   : > { %1893 = vadd.xlane.f32.xlu0 %v1892_v60  ;;  %1813 = vadd.xlane.f32.xlu1 %v1812_v42 }
 0x1e4   : > { %2125 = vadd.xlane.f32.xlu1 %v2124_v63 }
 0x1f5   : > { %1874 = vperm.xlu1 %2412, %v1857_v2  }
 0x1f6   : > { %1623 = vperm.xlu0 %2411, %v1615_v11  }
 0x1fa   : > { %1702 = vperm.xlu0 %2411, %v1694_v18  }
 0x1fe   : > { %1783 = vperm.xlu0 %2411, %v1775_v3  }
 0x202   : > { %1864 = vperm.xlu0 %2411, %v1856_v4  }
 0x25d   : > { %v1579_v8 = vpop.xlane.xlu1 %1578 }
 0x25e   : > { %v1580_v59 = vsel %vm1570_vm0, %v1579_v8, 0.0 }
 0x25f   : > { %v1581_v46 = vrot.slane %v1580_v59, 4 }
 0x261   : > { %v1582_v43 = vadd.f32 %v1581_v46, %v1580_v59  ;;  %v1966_v36 = vpop.xlane.xlu0 %1965  ;;  %v1652_v50 = vpop.xlane.xlu1 %1651 }
 0x262   : > { %v1968_v14 = vrot.slane %v1966_v36, 2  ;;  %v1654_v37 = vrot.slane %v1652_v50, 2 }
 0x263   : > { %v1583_v52 = vrot.slane %v1582_v43, 2 }
 0x264   : > { %v1970_v5 = vsel %vm1570_vm0, %v1968_v14, 0.0  ;;  %v1656_v30 = vsel %vm1570_vm0, %v1654_v37, 0.0 }
 0x265   : > { %v1584_v25 = vadd.f32 %v1583_v52, %v1582_v43  ;;  %v1971_v55 = vrot.slane %v1970_v5, 4  ;;  %v1657_v16 = vrot.slane %v1656_v30, 4  ;;  %v3547_v20 = vpop.xlane.xlu0 %2045  ;;  %v1733_v7 = vpop.xlane.xlu1 %1732 }
 0x266   : > { %v1735_v27 = vrot.slane %v1733_v7, 4 }
 0x267   : > { %v1585_v28 = vrot.slane %v1584_v25, 1  ;;  %v1972_v44 = vadd.f32 %v1971_v55, %v1970_v5  ;;  %v1658_v38 = vadd.f32 %v1657_v16, %v1656_v30 }
 0x268   : > { %v1737_v39 = vsel %vm1570_vm0, %v1735_v27, 0.0 }
 0x269   : > { %v1586_v53 = vadd.f32 %v1585_v28, %v1584_v25  ;;  %v1659_v24 = vrot.slane %v1658_v38, 2  ;;  %v1894_v47 = vpop.xlane.xlu0 %1893  ;;  %v1814_v35 = vpop.xlane.xlu1 %1813  ;;  %v1738_v1 = vrot.slane %v1737_v39, 4  ;;  %v1973_v34 = vrot.slane %v1972_v44, 2 }
 0x26a   : > { %v1895_v22 = vsel %vm1570_vm0, %v1894_v47, 0.0  ;;  %v1816_v61 = vrot.slane %v1814_v35, 6 }
 0x26b   : > { %v1660_v0 = vadd.f32 %v1659_v24, %v1658_v38  ;;  %v1587_v57 = vmul.f32 0.0009765625, %v1586_v53  ;;  %v1739_v48 = vadd.f32 %v1738_v1, %v1737_v39  ;;  %v1896_v21 = vrot.slane %v1895_v22, 4 }
 0x26c   : > { %v1818_v40 = vsel %vm1570_vm0, %v1816_v61, 0.0  ;;  %v1974_v33 = vadd.f32 %v1973_v34, %v1972_v44 }
 0x26d   : > { %v1661_v26 = vrot.slane %v1660_v0, 1  ;;  %v1819_v12 = vrot.slane %v1818_v40, 4  ;;  %v1740_v54 = vrot.slane %v1739_v48, 2  ;;  %v1897_v41 = vadd.f32 %v1896_v21, %v1895_v22 }
 0x26e   : > { %v3553_v23 = vsub.f32 %v3443_v6, %v1587_v57  ;;  %v3556_v31 = vsub.f32 %v3445_v10, %v1587_v57  ;;  %v3559_v2 = vsub.f32 %v3461_v15, %v1587_v57  ;;  %v3562_v11 = vsub.f32 %v3471_v62, %v1587_v57 }
 0x26f   : > { %v1820_v56 = vadd.f32 %v1819_v12, %v1818_v40  ;;  %v1741_v32 = vadd.f32 %v1740_v54, %v1739_v48  ;;  %v1662_v13 = vadd.f32 %v1661_v26, %v1660_v0  ;;  %v1898_v60 = vrot.slane %v1897_v41, 2 }
 0x270   : > { %v1975_v18 = vrot.slane %v1974_v33, 1  ;;  %v1592_v4 = vmul.f32 %v3553_v23, %v3553_v23  ;;  %v1593_v46 = vmul.f32 %v3556_v31, %v3556_v31  ;;  %v1594_v43 = vmul.f32 %v3559_v2, %v3559_v2 }
 0x271   : > { %v1821_v42 = vrot.slane %v1820_v56, 2  ;;  %v1742_v29 = vrot.slane %v1741_v32, 1  ;;  %v1663_v8 = vmul.f32 0.0009765625, %v1662_v13  ;;  %v1899_v59 = vadd.f32 %v1898_v60, %v1897_v41 }
 0x272   : > { %v1595_v14 = vmul.f32 %v3562_v11, %v3562_v11  ;;  %v1596_v37 = vsel %vm1570_vm0, %v1592_v4, 0.0  ;;  %v1597_v52 = vsel %vm1570_vm0, %v1593_v46, 0.0  ;;  %v1976_v5 = vadd.f32 %v1975_v18, %v1974_v33 }
 0x273   : > { %v1822_v63 = vadd.f32 %v1821_v42, %v1820_v56  ;;  %v1743_v3 = vadd.f32 %v1742_v29, %v1741_v32  ;;  %v1598_v30 = vadd.f32 %v1597_v52, %v1596_v37  ;;  %v1900_v25 = vrot.slane %v1899_v59, 1 }
 0x274   : > { %v1599_v55 = vsel %vm1570_vm0, %v1594_v43, 0.0  ;;  %v3576_v16 = vsub.f32 %v3443_v6, %v1663_v8  ;;  %v3579_v7 = vsub.f32 %v3445_v10, %v1663_v8  ;;  %v1601_v44 = vsel %vm1570_vm0, %v1595_v14, 0.0 }
 0x275   : > { %v1823_v36 = vrot.slane %v1822_v63, 1  ;;  %v1744_v50 = vmul.f32 0.0009765625, %v1743_v3  ;;  %v1600_v28 = vadd.f32 %v1599_v55, %v1598_v30  ;;  %v3583_v38 = vsub.f32 %v3461_v15, %v1663_v8 }
 0x276   : > { %v3586_v39 = vsub.f32 %v3471_v62, %v1663_v8  ;;  %v1668_v53 = vmul.f32 %v3576_v16, %v3576_v16  ;;  %v1669_v24 = vmul.f32 %v3579_v7, %v3579_v7  ;;  %v1977_v35 = vmul.f32 0.0009765625, %v1976_v5 }
 0x277   : > { %v1824_v27 = vadd.f32 %v1823_v36, %v1822_v63  ;;  %v3593_v47 = vsub.f32 %v3443_v6, %v1744_v50  ;;  %v1602_v1 = vadd.f32 %v1601_v44, %v1600_v28  ;;  %v1670_v22 = vmul.f32 %v3583_v38, %v3583_v38 }
 0x278   : > { %v3598_v61 = vsub.f32 %v3445_v10, %v1744_v50  ;;  %v1671_v34 = vmul.f32 %v3586_v39, %v3586_v39  ;;  %v1672_v0 = vsel %vm1643_vm1, %v1668_v53, 0.0  ;;  %v1673_v57 = vsel %vm1643_vm1, %v1669_v24, 0.0 }
 0x279   : > { %v3605_v48 = vsub.f32 %v3461_v15, %v1744_v50  ;;  %v1901_v21 = vadd.f32 %v1900_v25, %v1899_v59  ;;  %v1825_v40 = vmul.f32 0.0009765625, %v1824_v27  ;;  %1603 = vadd.xlane.f32.xlu0 %v1602_v1  ;;  %v1674_v26 = vadd.f32 %v1673_v57, %v1672_v0 }
 0x27a   : > { %v1675_v12 = vsel %vm1643_vm1, %v1670_v22, 0.0  ;;  %v1677_v54 = vsel %vm1643_vm1, %v1671_v34, 0.0  ;;  %v3610_v41 = vsub.f32 %v3471_v62, %v1744_v50  ;;  %v1749_v56 = vmul.f32 %v3593_v47, %v3593_v47 }
 0x27b   : > { %v1750_v33 = vmul.f32 %v3598_v61, %v3598_v61  ;;  %v1676_v32 = vadd.f32 %v1675_v12, %v1674_v26  ;;  %v1751_v13 = vmul.f32 %v3605_v48, %v3605_v48  ;;  %v3619_v60 = vsub.f32 %v3447_v17, %v1977_v35 }
 0x27c   : > { %v3622_v42 = vsub.f32 %v3449_v58, %v1977_v35  ;;  %v1752_v29 = vmul.f32 %v3610_v41, %v3610_v41  ;;  %v1753_v63 = vsel %vm1724_vm2, %v1749_v56, 0.0  ;;  %v3629_v3 = vsub.f32 %v3479_v9, %v1977_v35 }
 0x27d   : > { %v1754_v18 = vsel %vm1724_vm2, %v1750_v33, 0.0  ;;  %v1902_v4 = vmul.f32 0.0009765625, %v1901_v21  ;;  %v1678_v8 = vadd.f32 %v1677_v54, %v1676_v32  ;;  %v3632_v46 = vsub.f32 %v3489_v49, %v1977_v35 }
 0x27e   : > { %v1755_v59 = vadd.f32 %v1754_v18, %v1753_v63  ;;  %v1756_v43 = vsel %vm1724_vm2, %v1751_v13, 0.0  ;;  %v1982_v36 = vmul.f32 %v3619_v60, %v3619_v60  ;;  %v1983_v50 = vmul.f32 %v3622_v42, %v3622_v42 }
 0x27f   : > { %v1984_v14 = vmul.f32 %v3629_v3, %v3629_v3  ;;  %1679 = vadd.xlane.f32.xlu0 %v1678_v8  ;;  %v1985_v52 = vmul.f32 %v3632_v46, %v3632_v46  ;;  %v3644_v5 = vsub.f32 %v3443_v6, %v1825_v40  ;;  %v3647_v30 = vsub.f32 %v3445_v10, %v1825_v40 }
 0x280   : > { %v1757_v37 = vadd.f32 %v1756_v43, %v1755_v59  ;;  %v1758_v25 = vsel %vm1724_vm2, %v1752_v29, 0.0  ;;  %v1986_v55 = vsel %vm1643_vm1, %v1982_v36, 0.0  ;;  %v1987_v27 = vsel %vm1643_vm1, %v1983_v50, 0.0 }
 0x281   : > { %v3653_v28 = vsub.f32 %v3461_v15, %v1825_v40  ;;  %v1988_v53 = vadd.f32 %v1987_v27, %v1986_v55  ;;  %v1989_v24 = vsel %vm1643_vm1, %v1984_v14, 0.0  ;;  %v3657_v35 = vsub.f32 %v3471_v62, %v1825_v40 }
 0x282   : > { %v1759_v44 = vadd.f32 %v1758_v25, %v1757_v37  ;;  %v1830_v6 = vmul.f32 %v3644_v5, %v3644_v5  ;;  %v1831_v10 = vmul.f32 %v3647_v30, %v3647_v30  ;;  %v3666_v22 = vsub.f32 %v3447_v17, %v1902_v4 }
 0x283   : > { %v1832_v1 = vmul.f32 %v3653_v28, %v3653_v28  ;;  %v1990_v15 = vadd.f32 %v1989_v24, %v1988_v53  ;;  %v1991_v34 = vsel %vm1643_vm1, %v1985_v52, 0.0  ;;  %v3670_v0 = vsub.f32 %v3449_v58, %v1902_v4  ;;  %v2126_v52 = vpop.xlane.xlu1 %2125 }
 0x284   : > { %1760 = vadd.xlane.f32.xlu0 %v1759_v44  ;;  %v3673_v62 = vsub.f32 %v3479_v9, %v1902_v4  ;;  %v1833_v57 = vmul.f32 %v3657_v35, %v3657_v35  ;;  %v1834_v21 = vsel %vm1805_vm3, %v1830_v6, 0.0  ;;  %v1835_v40 = vsel %vm1805_vm3, %v1831_v10, 0.0  ;;  %v1930_v10 = vld [vmem:[%s3931_s3 + $0x8] sm:$0x3] }
 0x285   : > { %v3680_v26 = vsub.f32 %v3489_v49, %v1902_v4  ;;  %v1992_v12 = vadd.f32 %v1991_v34, %v1990_v15  ;;  %v1836_v54 = vadd.f32 %v1835_v40, %v1834_v21  ;;  %v1907_v56 = vmul.f32 %v3666_v22, %v3666_v22  ;;  %v1931_v34 = vld [vmem:[%s3932_s4 + $0x8] sm:$0x3]  ;;  %v2008_v40 = vld [vmem:[%s3931_s3 + $0xa] sm:$0x3] }
 0x286   : > { %v1837_v33 = vsel %vm1805_vm3, %v1832_v1, 0.0  ;;  %v1908_v32 = vmul.f32 %v3670_v0, %v3670_v0  ;;  %v1909_v13 = vmul.f32 %v3673_v62, %v3673_v62  ;;  %v1839_v18 = vsel %vm1805_vm3, %v1833_v57, 0.0 }
 0x287   : > { %v1838_v29 = vadd.f32 %v1837_v33, %v1836_v54  ;;  %v1911_v63 = vsel %vm1570_vm0, %v1907_v56, 0.0  ;;  %v1910_v4 = vmul.f32 %v3680_v26, %v3680_v26  ;;  %v2048_v14 = vrot.slane %v3547_v20, 4  ;;  %v2009_v20 = vld [vmem:[%s3932_s4 + $0xa] sm:$0x3]  ;;  %v2089_v56 = vld [vmem:[%s3932_s4 + $0xc] sm:$0x3] }
 0x288   : > { %1993 = vadd.xlane.f32.xlu0 %v1992_v12  ;;  %v1912_v8 = vsel %vm1570_vm0, %v1908_v32, 0.0  ;;  %v1914_v36 = vsel %vm1570_vm0, %v1909_v13, 0.0  ;;  %v2128_v27 = vrot.slane %v2126_v52, 6  ;;  %v2169_v13 = vld [vmem:[%s3932_s4 + $0xe] sm:$0x3] }
 0x289   : > { %v1840_v59 = vadd.f32 %v1839_v18, %v1838_v29  ;;  %v1913_v43 = vadd.f32 %v1912_v8, %v1911_v63  ;;  %v1916_v37 = vsel %vm1570_vm0, %v1910_v4, 0.0  ;;  %v2050_v55 = vsel %vm1570_vm0, %v2048_v14, 0.0 }
 0x28a   : > { %v2051_v44 = vrot.slane %v2050_v55, 4  ;;  %v2130_v53 = vsel %vm1570_vm0, %v2128_v27, 0.0 }
 0x28b   : > { %1841 = vadd.xlane.f32.xlu1 %v1840_v59  ;;  %v1915_v50 = vadd.f32 %v1914_v36, %v1913_v43  ;;  %v2131_v6 = vrot.slane %v2130_v53, 4 }
 0x28c   : > { %v2052_v24 = vadd.f32 %v2051_v44, %v2050_v55 }
 0x28d   : > { %v1917_v25 = vadd.f32 %v1916_v37, %v1915_v50  ;;  %v2132_v15 = vadd.f32 %v2131_v6, %v2130_v53 }
 0x28e   : > { %v2053_v1 = vrot.slane %v2052_v24, 2 }
 0x28f   : > { %1918 = vadd.xlane.f32.xlu1 %v1917_v25  ;;  %v2133_v21 = vrot.slane %v2132_v15, 2 }
 0x290   : > { %v2054_v57 = vadd.f32 %v2053_v1, %v2052_v24 }
 0x291   : > { %v2134_v54 = vadd.f32 %v2133_v21, %v2132_v15 }
 0x292   : > { %v2055_v12 = vrot.slane %v2054_v57, 1 }
 0x293   : > { %v2135_v32 = vrot.slane %v2134_v54, 1 }
 0x294   : > { %v2056_v33 = vadd.f32 %v2055_v12, %v2054_v57 }
 0x295   : > { %v2136_v63 = vadd.f32 %v2135_v32, %v2134_v54  ;;  %v3771_v32 = vpop.permute.xlu0 %1623 }
 0x296   : > { %v2057_v29 = vmul.f32 0.0009765625, %v2056_v33  ;;  %v2168_v33 = vld [vmem:[%s3931_s3 + $0xe] sm:$0x3] }
 0x297   : > { %v2137_v18 = vmul.f32 0.0009765625, %v2136_v63 }
 0x298   : > { %v3718_v4 = vsub.f32 %v3447_v17, %v2057_v29  ;;  %v3721_v8 = vsub.f32 %v3449_v58, %v2057_v29  ;;  %v3734_v14 = vsub.f32 %v3479_v9, %v2057_v29  ;;  %v3743_v27 = vsub.f32 %v3489_v49, %v2057_v29 }
 0x299   : > { %v3728_v36 = vsub.f32 %v3447_v17, %v2137_v18  ;;  %v3731_v50 = vsub.f32 %v3449_v58, %v2137_v18  ;;  %v3748_v58 = vsub.f32 %v3479_v9, %v2137_v18  ;;  %v3756_v1 = vsub.f32 %v3489_v49, %v2137_v18  ;;  %v2088_v49 = vld [vmem:[%s3931_s3 + $0xc] sm:$0x3] }
 0x29a   : > { %v2062_v59 = vmul.f32 %v3718_v4, %v3718_v4  ;;  %v2063_v43 = vmul.f32 %v3721_v8, %v3721_v8  ;;  %v2064_v17 = vmul.f32 %v3734_v14, %v3734_v14  ;;  %v2065_v6 = vmul.f32 %v3743_v27, %v3743_v27 }
 0x29b   : > { %v2142_v25 = vmul.f32 %v3728_v36, %v3728_v36  ;;  %v2143_v55 = vmul.f32 %v3731_v50, %v3731_v50  ;;  %3986 = vst [vmem:[#allocation9_spill] sm:$0xff] %v3756_v1  ;;  %v2144_v15 = vmul.f32 %v3748_v58, %v3748_v58  ;;  %v2145_v57 = vmul.f32 %v3756_v1, %v3756_v1 }
 0x29c   : > { %v2066_v37 = vsel %vm1724_vm2, %v2062_v59, 0.0  ;;  %v2067_v52 = vsel %vm1724_vm2, %v2063_v43, 0.0  ;;  %v2071_v9 = vsel %vm1724_vm2, %v2065_v6, 0.0 }
 0x29d   : > { %v2068_v44 = vadd.f32 %v2067_v52, %v2066_v37  ;;  %v2146_v53 = vsel %vm1805_vm3, %v2142_v25, 0.0  ;;  %v2147_v24 = vsel %vm1805_vm3, %v2143_v55, 0.0  ;;  %v2149_v21 = vsel %vm1805_vm3, %v2144_v15, 0.0 }
 0x29e   : > { %1938 = vperm.xlu0 %2411, %v1930_v10   ;;  %v2069_v10 = vsel %vm1724_vm2, %v2064_v17, 0.0  ;;  %v2151_v54 = vsel %vm1805_vm3, %v2145_v57, 0.0 }
 0x2a0   : > { %2026 = vperm.xlu1 %2412, %v2009_v20   ;;  %v2070_v20 = vadd.f32 %v2069_v10, %v2068_v44 }
 0x2a2   : > { %1947 = vperm.xlu0 %2411, %v1931_v34   ;;  %v2148_v34 = vadd.f32 %v2147_v24, %v2146_v53 }
 0x2a4   : > { %v2150_v12 = vadd.f32 %v2149_v21, %v2148_v34  ;;  %v1875_v34 = vpop.permute.xlu1 %1874 }
 0x2a6   : > { %2016 = vperm.xlu0 %2411, %v2008_v40   ;;  %v2072_v40 = vadd.f32 %v2071_v9, %v2070_v20 }
 0x2aa   : > { %2106 = vperm.xlu0 %2411, %v2089_v56   ;;  %v2152_v56 = vadd.f32 %v2151_v54, %v2150_v12 }
 0x2ae   : > { %2186 = vperm.xlu0 %2411, %v2169_v13   ;;  %v3773_v13 = vpop.permute.xlu0 %1702 }
 0x2b2   : > { %v3775_v29 = vpop.permute.xlu0 %1783 }
 0x2b6   : > { %v3777_v63 = vpop.permute.xlu0 %1864 }
 0x2c4   : > { %2073 = vadd.xlane.f32.xlu1 %v2072_v40 }
 0x2c8   : > { %2153 = vadd.xlane.f32.xlu1 %v2152_v56 }
 0x2d9   : > { %2096 = vperm.xlu1 %2412, %v2088_v49  }
 0x2dd   : > { %2176 = vperm.xlu1 %2412, %v2168_v33  }
 0x302   : > { %v1604_v18 = vpop.xlane.xlu0 %1603 }
 0x303   : > { %v1605_v59 = vsel %vm1570_vm0, %v1604_v18, 0.0 }
 0x304   : > { %v1606_v43 = vrot.slane %v1605_v59, 4 }
 0x306   : > { %v1607_v37 = vadd.f32 %v1606_v43, %v1605_v59 }
 0x308   : > { %v1608_v52 = vrot.slane %v1607_v37, 2  ;;  %v1680_v25 = vpop.xlane.xlu0 %1679 }
 0x309   : > { %v1682_v55 = vrot.slane %v1680_v25, 2 }
 0x30a   : > { %v1609_v17 = vadd.f32 %v1608_v52, %v1607_v37 }
 0x30b   : > { %v1684_v44 = vsel %vm1570_vm0, %v1682_v55, 0.0 }
 0x30c   : > { %v1685_v53 = vrot.slane %v1684_v44, 4  ;;  %v1610_v10 = vrot.slane %v1609_v17, 1 }
 0x30d   : > { %v1761_v24 = vpop.xlane.xlu0 %1760 }
 0x30e   : > { %v1763_v6 = vrot.slane %v1761_v24, 4  ;;  %v1686_v15 = vadd.f32 %v1685_v53, %v1684_v44  ;;  %v1611_v21 = vadd.f32 %v1610_v10, %v1609_v17 }
 0x310   : > { %v1765_v20 = vsel %vm1570_vm0, %v1763_v6, 0.0  ;;  %v1687_v9 = vrot.slane %v1686_v15, 2  ;;  %v1612_v18 = vmul.f32 0.0009765625, %v1611_v21 }
 0x311   : > { %v1766_v57 = vrot.slane %v1765_v20, 4  ;;  %v1994_v10 = vpop.xlane.xlu0 %1993 }
 0x312   : > { %v1688_v40 = vadd.f32 %v1687_v9, %v1686_v15  ;;  %v1613_v44 = vadd.f32 1e-05, %v1612_v18  ;;  %v1996_v9 = vrot.slane %v1994_v10, 2 }
 0x313   : > { %v1767_v12 = vadd.f32 %v1766_v57, %v1765_v20 }
 0x314   : > { %v1689_v54 = vrot.slane %v1688_v40, 1  ;;  %v1842_v49 = vpop.xlane.xlu1 %1841  ;;  %2417 = vrsqrt.f32 %v1613_v44 }
 0x315   : > { %v1768_v56 = vrot.slane %v1767_v12, 2  ;;  %v1844_v33 = vrot.slane %v1842_v49, 6 }
 0x316   : > { %v1690_v59 = vadd.f32 %v1689_v54, %v1688_v40  ;;  %v1998_v40 = vsel %vm1570_vm0, %v1996_v9, 0.0 }
 0x317   : > { %v1769_v43 = vadd.f32 %v1768_v56, %v1767_v12  ;;  %v1846_v37 = vsel %vm1570_vm0, %v1844_v33, 0.0  ;;  %v1999_v56 = vrot.slane %v1998_v40, 4 }
 0x318   : > { %v1691_v52 = vmul.f32 0.0009765625, %v1690_v59  ;;  %v1847_v55 = vrot.slane %v1846_v37, 4  ;;  %v1919_v49 = vpop.xlane.xlu1 %1918 }
 0x319   : > { %v1770_v25 = vrot.slane %v1769_v43, 1  ;;  %v2000_v18 = vadd.f32 %v1999_v56, %v1998_v40  ;;  %v1920_v59 = vsel %vm1570_vm0, %v1919_v49, 0.0 }
 0x31a   : > { %v1848_v24 = vadd.f32 %v1847_v55, %v1846_v37  ;;  %v1692_v6 = vadd.f32 1e-05, %v1691_v52  ;;  %v1795_v37 = vrot.slane %v3542_v19, 4  ;;  %v1921_v10 = vrot.slane %v1920_v59, 4 }
 0x31b   : > { %v1771_v53 = vadd.f32 %v1770_v25, %v1769_v43 }
 0x31c   : > { %v1849_v17 = vrot.slane %v1848_v24, 2  ;;  %2419 = vrsqrt.f32 %v1692_v6  ;;  %v1704_v6 = vrot.slane %v3773_v13, 6 }
 0x31d   : > { %v1772_v1 = vmul.f32 0.0009765625, %v1771_v53 }
 0x31e   : > { %v1850_v20 = vadd.f32 %v1849_v17, %v1848_v24  ;;  %v1876_v24 = vrot.slane %v1875_v34, 2  ;;  %v2001_v17 = vrot.slane %v2000_v18, 2 }
 0x31f   : > { %v1773_v15 = vadd.f32 1e-05, %v1772_v1  ;;  %v1714_v1 = vrot.slane %v3540_v45, 6 }
 0x320   : > { %v1851_v57 = vrot.slane %v1850_v20, 1  ;;  %v3806_v9 = vadd.f32 %v2001_v17, %v2000_v18 }
 0x321   : > { %2421 = vrsqrt.f32 %v1773_v15  ;;  %v2418_v33 = vpop.eup %2417 }
 0x322   : > { %v1852_v21 = vadd.f32 %v1851_v57, %v1850_v20  ;;  %v1617_v25 = vmul.f32 %v2418_v33, %v3553_v23  ;;  %v1618_v55 = vmul.f32 %v2418_v33, %v3556_v31  ;;  %v1619_v44 = vmul.f32 %v2418_v33, %v3559_v2 }
 0x323   : > { %v1620_v53 = vmul.f32 %v2418_v33, %v3562_v11 }
 0x324   : > { %v1853_v12 = vmul.f32 0.0009765625, %v1852_v21  ;;  %v1626_v13 = vmul.f32 %v3771_v32, %v1617_v25  ;;  %v1627_v34 = vmul.f32 %v3771_v32, %v1618_v55 }
 0x326   : > { %v1854_v54 = vadd.f32 1e-05, %v1853_v12  ;;  %v1635_v49 = vadd.f32 %v3538_v51, %v1626_v13 }
 0x328   : > { %2423 = vrsqrt.f32 %v1854_v54 }
 0x329   : > { %v2420_v43 = vpop.eup %2419 }
 0x32a   : > { %v1696_v15 = vmul.f32 %v2420_v43, %v3576_v16  ;;  %v1697_v45 = vmul.f32 %v2420_v43, %v3579_v7  ;;  %v1698_v19 = vmul.f32 %v2420_v43, %v3583_v38  ;;  %v1699_v20 = vmul.f32 %v2420_v43, %v3586_v39 }
 0x32b   : > { %v1628_v16 = vmul.f32 %v3771_v32, %v1619_v44  ;;  %v1629_v7 = vmul.f32 %v3771_v32, %v1620_v53  ;;  %v1785_v38 = vrot.slane %v3775_v29, 4  ;;  %v1866_v39 = vrot.slane %v3777_v63, 2 }
 0x32c   : > { %v1708_v57 = vmul.f32 %v1704_v6, %v1698_v19  ;;  %v1636_v32 = vadd.f32 %v3538_v51, %v1627_v34  ;;  %v1639_v19 = vmax.f32 %v1635_v49, 0.0 }
 0x32d   : > { %v1637_v29 = vadd.f32 %v3538_v51, %v1628_v16  ;;  %v1638_v63 = vadd.f32 %v3538_v51, %v1629_v7 }
 0x32e   : > { %v2422_v52 = vpop.eup %2421  ;;  %v1718_v55 = vadd.f32 %v1714_v1, %v1708_v57 }
 0x32f   : > { %v1777_v23 = vmul.f32 %v2422_v52, %v3593_v47  ;;  %v1778_v31 = vmul.f32 %v2422_v52, %v3598_v61  ;;  %v1779_v2 = vmul.f32 %v2422_v52, %v3605_v48  ;;  %v1780_v11 = vmul.f32 %v2422_v52, %v3610_v41 }
 0x330   : > { %v3808_v47 = vadd.f32 %v1921_v10, %v1920_v59  ;;  %v1706_v61 = vmul.f32 %v1704_v6, %v1696_v15  ;;  %v1707_v48 = vmul.f32 %v1704_v6, %v1697_v45  ;;  %v1709_v41 = vmul.f32 %v1704_v6, %v1699_v20 }
 0x331   : > { %v1787_v40 = vmul.f32 %v1785_v38, %v1777_v23  ;;  %v1788_v12 = vmul.f32 %v1785_v38, %v1778_v31  ;;  %v1789_v54 = vmul.f32 %v1785_v38, %v1779_v2  ;;  %v1790_v56 = vmul.f32 %v1785_v38, %v1780_v11 }
 0x332   : > { %v1716_v52 = vadd.f32 %v1714_v1, %v1706_v61  ;;  %v1717_v25 = vadd.f32 %v1714_v1, %v1707_v48  ;;  %v1719_v44 = vadd.f32 %v1714_v1, %v1709_v41  ;;  %v1641_v20 = vmax.f32 %v1637_v29, 0.0 }
 0x333   : > { %v1797_v53 = vadd.f32 %v1795_v37, %v1787_v40  ;;  %v1798_v6 = vadd.f32 %v1795_v37, %v1788_v12  ;;  %v1799_v17 = vadd.f32 %v1795_v37, %v1789_v54  ;;  %v1800_v10 = vadd.f32 %v1795_v37, %v1790_v56 }
 0x334   : > { %v1720_v11 = vmax.f32 %v1716_v52, 0.0  ;;  %v1721_v1 = vmax.f32 %v1717_v25, 0.0  ;;  %v1722_v13 = vmax.f32 %v1718_v55, 0.0  ;;  %v1723_v34 = vmax.f32 %v1719_v44, 0.0  ;;  %v2027_v55 = vpop.permute.xlu1 %2026 }
 0x335   : > { %v2424_v21 = vpop.eup %2423  ;;  %v1801_v37 = vmax.f32 %v1797_v53, 0.0  ;;  %v1802_v16 = vmax.f32 %v1798_v6, 0.0  ;;  %v1803_v7 = vmax.f32 %v1799_v17, 0.0  ;;  %v1804_v38 = vmax.f32 %v1800_v10, 0.0 }
 0x336   : > { %v1858_v33 = vmul.f32 %v2424_v21, %v3644_v5  ;;  %v1859_v18 = vmul.f32 %v2424_v21, %v3647_v30  ;;  %v1860_v59 = vmul.f32 %v2424_v21, %v3653_v28  ;;  %v1861_v43 = vmul.f32 %v2424_v21, %v3657_v35 }
 0x337   : > { %v1640_v30 = vmax.f32 %v1636_v32, 0.0  ;;  %v1642_v28 = vmax.f32 %v1638_v63, 0.0  ;;  %v2003_v41 = vrot.slane %v3806_v9, 1  ;;  %v1923_v21 = vrot.slane %v3808_v47, 2 }
 0x338   : > { %v1868_v15 = vmul.f32 %v1866_v39, %v1858_v33  ;;  %v1869_v45 = vmul.f32 %v1866_v39, %v1859_v18  ;;  %v1870_v51 = vmul.f32 %v1866_v39, %v1860_v59  ;;  %v1871_v5 = vmul.f32 %v1866_v39, %v1861_v43 }
 0x339   : > { %v2199_v40 = vsel %vm1570_vm0, %v1640_v30, %v1721_v1  ;;  %v2200_v12 = vsel %vm1570_vm0, %v1641_v20, %v1722_v13  ;;  %v2201_v54 = vsel %vm1570_vm0, %v1642_v28, %v1723_v34  ;;  %v1924_v43 = vadd.f32 %v1923_v21, %v3808_v47 }
 0x33a   : > { %v1878_v23 = vadd.f32 %v1876_v24, %v1868_v15  ;;  %v1879_v35 = vadd.f32 %v1876_v24, %v1869_v45  ;;  %v1880_v31 = vadd.f32 %v1876_v24, %v1870_v51  ;;  %v1881_v2 = vadd.f32 %v1876_v24, %v1871_v5  ;;  %v1939_v5 = vpop.permute.xlu0 %1938 }
 0x33b   : > { %v2198_v24 = vsel %vm1570_vm0, %v1639_v19, %v1720_v11  ;;  %v2203_v49 = vsel %vm1403_vm9, %v2199_v40, %v1802_v16  ;;  %v2204_v32 = vsel %vm1403_vm9, %v2200_v12, %v1803_v7  ;;  %v2205_v29 = vsel %vm1403_vm9, %v2201_v54, %v1804_v38 }
 0x33c   : > { %v1882_v39 = vmax.f32 %v1878_v23, 0.0  ;;  %v1883_v61 = vmax.f32 %v1879_v35, 0.0  ;;  %v1884_v48 = vmax.f32 %v1880_v31, 0.0  ;;  %v1885_v57 = vmax.f32 %v1881_v2, 0.0 }
 0x33d   : > { %v2202_v56 = vsel %vm1403_vm9, %v2198_v24, %v1801_v37  ;;  %v2004_v52 = vadd.f32 %v2003_v41, %v3806_v9  ;;  %v1925_v25 = vrot.slane %v1924_v43, 1 }
 0x33e   : > { %v2207_v63 = vsel %vm2206_vm4, %v2202_v56, %v1882_v39  ;;  %v2208_v33 = vsel %vm2206_vm4, %v2203_v49, %v1883_v61  ;;  %v2209_v18 = vsel %vm2206_vm4, %v2204_v32, %v1884_v48  ;;  %v2210_v59 = vsel %vm2206_vm4, %v2205_v29, %v1885_v57  ;;  %v1948_v2 = vpop.permute.xlu0 %1947 }
 0x33f   : > { %2223 = vst [vmem:[%s3836_s10] sm:$0xff] %v2207_v63  ;;  %2224 = vst [vmem:[%s3836_s10 + $0x8] sm:$0xff] %v2208_v33  ;;  %v2005_v44 = vmul.f32 0.0009765625, %v2004_v52  ;;  %v1926_v53 = vadd.f32 %v1925_v25, %v1924_v43  ;;  %v2028_v32 = vrot.slane %v2027_v55, 6 }
 0x340   : > { %2225 = vst [vmem:[%s3836_s10 + $0x10] sm:$0xff] %v2209_v18  ;;  %2226 = vst [vmem:[%s3836_s10 + $0x18] sm:$0xff] %v2210_v59 }
 0x341   : > { %v2006_v17 = vadd.f32 1e-05, %v2005_v44  ;;  %v1927_v47 = vmul.f32 0.0009765625, %v1926_v53 }
 0x342   : > { %v2017_v7 = vpop.permute.xlu0 %2016 }
 0x343   : > { %2425 = vrsqrt.f32 %v2006_v17  ;;  %v1928_v20 = vadd.f32 1e-05, %v1927_v47  ;;  %v2018_v21 = vrot.slane %v2017_v7, 6 }
 0x345   : > { %2427 = vrsqrt.f32 %v1928_v20 }
 0x346   : > { %v2107_v24 = vpop.permute.xlu0 %2106 }
 0x347   : > { %v2108_v55 = vrot.slane %v2107_v24, 4 }
 0x34a   : > { %v2187_v25 = vpop.permute.xlu0 %2186 }
 0x34b   : > { %v2188_v17 = vrot.slane %v2187_v25, 2 }
 0x34d   : > { %v2074_v6 = vpop.xlane.xlu1 %2073 }
 0x34e   : > { %v2076_v10 = vrot.slane %v2074_v6, 4 }
 0x350   : > { %v2078_v15 = vsel %vm1570_vm0, %v2076_v10, 0.0  ;;  %v2426_v38 = vpop.eup %2425 }
 0x351   : > { %v2079_v45 = vrot.slane %v2078_v15, 4  ;;  %v2154_v51 = vpop.xlane.xlu1 %2153  ;;  %v2010_v57 = vmul.f32 %v2426_v38, %v3619_v60  ;;  %v2011_v12 = vmul.f32 %v2426_v38, %v3622_v42  ;;  %v2012_v54 = vmul.f32 %v2426_v38, %v3629_v3 }
 0x352   : > { %v2156_v19 = vrot.slane %v2154_v51, 6  ;;  %v2428_v40 = vpop.eup %2427  ;;  %v2013_v56 = vmul.f32 %v2426_v38, %v3632_v46  ;;  %v3987_v38 = vld [vmem:[#allocation9_spill] sm:$0xff] }
 0x353   : > { %v2080_v30 = vadd.f32 %v2079_v45, %v2078_v15  ;;  %v2020_v49 = vmul.f32 %v2018_v21, %v2010_v57  ;;  %v1932_v29 = vmul.f32 %v2428_v40, %v3666_v22  ;;  %v1933_v63 = vmul.f32 %v2428_v40, %v3670_v0 }
 0x354   : > { %v2158_v28 = vsel %vm1570_vm0, %v2156_v19, 0.0  ;;  %v1934_v33 = vmul.f32 %v2428_v40, %v3673_v62  ;;  %v1935_v60 = vmul.f32 %v2428_v40, %v3680_v26  ;;  %v2021_v18 = vmul.f32 %v2018_v21, %v2011_v12 }
 0x355   : > { %v2081_v9 = vrot.slane %v2080_v30, 2  ;;  %v2159_v23 = vrot.slane %v2158_v28, 4  ;;  %v2097_v59 = vpop.permute.xlu1 %2096  ;;  %v2022_v43 = vmul.f32 %v2018_v21, %v2012_v54  ;;  %v2023_v52 = vmul.f32 %v2018_v21, %v2013_v56 }
 0x356   : > { %v2030_v42 = vadd.f32 %v2028_v32, %v2020_v49  ;;  %v1941_v44 = vmul.f32 %v1939_v5, %v1932_v29  ;;  %v1942_v3 = vmul.f32 %v1939_v5, %v1933_v63  ;;  %v1943_v53 = vmul.f32 %v1939_v5, %v1934_v33 }
 0x357   : > { %v2082_v35 = vadd.f32 %v2081_v9, %v2080_v30  ;;  %v2160_v31 = vadd.f32 %v2159_v23, %v2158_v28  ;;  %v1944_v46 = vmul.f32 %v1939_v5, %v1935_v60  ;;  %v2031_v6 = vadd.f32 %v2028_v32, %v2021_v18 }
 0x358   : > { %v2032_v10 = vadd.f32 %v2028_v32, %v2022_v43  ;;  %v2033_v0 = vadd.f32 %v2028_v32, %v2023_v52  ;;  %v2034_v47 = vmax.f32 %v2030_v42, 0.0  ;;  %v2098_v62 = vrot.slane %v2097_v59, 4 }
 0x359   : > { %v2083_v11 = vrot.slane %v2082_v35, 1  ;;  %v2161_v1 = vrot.slane %v2160_v31, 2  ;;  %v2177_v19 = vpop.permute.xlu1 %2176  ;;  %v1950_v30 = vadd.f32 %v1948_v2, %v1941_v44  ;;  %v1951_v20 = vadd.f32 %v1948_v2, %v1942_v3 }
 0x35a   : > { %v1952_v5 = vadd.f32 %v1948_v2, %v1943_v53  ;;  %v1953_v28 = vadd.f32 %v1948_v2, %v1944_v46 }
 0x35b   : > { %v2084_v13 = vadd.f32 %v2083_v11, %v2082_v35  ;;  %v2162_v34 = vadd.f32 %v2161_v1, %v2160_v31  ;;  %v2035_v1 = vmax.f32 %v2031_v6, 0.0 }
 0x35c   : > { %v1956_v57 = vmax.f32 %v1952_v5, 0.0 }
 0x35d   : > { %v2085_v37 = vmul.f32 0.0009765625, %v2084_v13  ;;  %v2163_v16 = vrot.slane %v2162_v34, 1  ;;  %v2036_v13 = vmax.f32 %v2032_v10, 0.0 }
 0x35f   : > { %v2086_v39 = vadd.f32 1e-05, %v2085_v37  ;;  %v2164_v61 = vadd.f32 %v2163_v16, %v2162_v34  ;;  %v2037_v34 = vmax.f32 %v2033_v0, 0.0  ;;  %v2213_v60 = vsel %vm1570_vm0, %v1956_v57, %v2036_v13 }
 0x361   : > { %2429 = vrsqrt.f32 %v2086_v39  ;;  %v2165_v48 = vmul.f32 0.0009765625, %v2164_v61  ;;  %v1954_v61 = vmax.f32 %v1950_v30, 0.0 }
 0x363   : > { %v2166_v41 = vadd.f32 1e-05, %v2165_v48  ;;  %v1955_v48 = vmax.f32 %v1951_v20, 0.0  ;;  %v2211_v63 = vsel %vm1570_vm0, %v1954_v61, %v2034_v47 }
 0x365   : > { %2431 = vrsqrt.f32 %v2166_v41  ;;  %v1957_v41 = vmax.f32 %v1953_v28, 0.0  ;;  %v2212_v33 = vsel %vm1570_vm0, %v1955_v48, %v2035_v1 }
 0x367   : > { %v2214_v18 = vsel %vm1570_vm0, %v1957_v41, %v2037_v34 }
 0x36e   : > { %v2430_v22 = vpop.eup %2429 }
 0x36f   : > { %v2090_v26 = vmul.f32 %v2430_v22, %v3718_v4  ;;  %v2091_v15 = vmul.f32 %v2430_v22, %v3721_v8  ;;  %v2092_v45 = vmul.f32 %v2430_v22, %v3734_v14  ;;  %v2093_v51 = vmul.f32 %v2430_v22, %v3743_v27 }
 0x370   : > { %v2178_v4 = vrot.slane %v2177_v19, 2 }
 0x371   : > { %v2100_v9 = vmul.f32 %v2098_v62, %v2090_v26  ;;  %v2101_v23 = vmul.f32 %v2098_v62, %v2091_v15  ;;  %v2102_v35 = vmul.f32 %v2098_v62, %v2092_v45  ;;  %v2103_v31 = vmul.f32 %v2098_v62, %v2093_v51 }
 0x372   : > { %v2432_v11 = vpop.eup %2431 }
 0x373   : > { %v2110_v37 = vadd.f32 %v2108_v55, %v2100_v9  ;;  %v2111_v8 = vadd.f32 %v2108_v55, %v2101_v23  ;;  %v2112_v16 = vadd.f32 %v2108_v55, %v2102_v35  ;;  %v2113_v14 = vadd.f32 %v2108_v55, %v2103_v31 }
 0x374   : > { %v2170_v27 = vmul.f32 %v2432_v11, %v3728_v36  ;;  %v2171_v7 = vmul.f32 %v2432_v11, %v3731_v50  ;;  %v2172_v2 = vmul.f32 %v2432_v11, %v3748_v58  ;;  %v2173_v39 = vmul.f32 %v2432_v11, %v3987_v38 }
 0x375   : > { %v2114_v54 = vmax.f32 %v2110_v37, 0.0  ;;  %v2115_v56 = vmax.f32 %v2111_v8, 0.0  ;;  %v2116_v49 = vmax.f32 %v2112_v16, 0.0  ;;  %v2117_v36 = vmax.f32 %v2113_v14, 0.0 }
 0x376   : > { %v2180_v21 = vmul.f32 %v2178_v4, %v2170_v27  ;;  %v2181_v24 = vmul.f32 %v2178_v4, %v2171_v7  ;;  %v2182_v40 = vmul.f32 %v2178_v4, %v2172_v2  ;;  %v2183_v12 = vmul.f32 %v2178_v4, %v2173_v39 }
 0x377   : > { %v2215_v25 = vsel %vm1403_vm9, %v2211_v63, %v2114_v54  ;;  %v2216_v44 = vsel %vm1403_vm9, %v2212_v33, %v2115_v56  ;;  %v2217_v3 = vsel %vm1403_vm9, %v2213_v60, %v2116_v49  ;;  %v2218_v53 = vsel %vm1403_vm9, %v2214_v18, %v2117_v36 }
 0x378   : > { %v2190_v50 = vadd.f32 %v2188_v17, %v2180_v21  ;;  %v2191_v32 = vadd.f32 %v2188_v17, %v2181_v24  ;;  %v2192_v29 = vadd.f32 %v2188_v17, %v2182_v40  ;;  %v2193_v58 = vadd.f32 %v2188_v17, %v2183_v12 }
 0x37a   : > { %v2194_v59 = vmax.f32 %v2190_v50, 0.0  ;;  %v2195_v43 = vmax.f32 %v2191_v32, 0.0  ;;  %v2196_v52 = vmax.f32 %v2192_v29, 0.0  ;;  %v2197_v42 = vmax.f32 %v2193_v58, 0.0 }
 0x37c   : > { %v2219_v46 = vsel %vm2206_vm4, %v2215_v25, %v2194_v59  ;;  %v2220_v6 = vsel %vm2206_vm4, %v2216_v44, %v2195_v43  ;;  %v2221_v55 = vsel %vm2206_vm4, %v2217_v3, %v2196_v52  ;;  %v2222_v17 = vsel %vm2206_vm4, %v2218_v53, %v2197_v42 }
 0x37d   : > { %2227 = vst [vmem:[%s3836_s10 + $0x20] sm:$0xff] %v2219_v46  ;;  %2228 = vst [vmem:[%s3836_s10 + $0x28] sm:$0xff] %v2220_v6 }
 0x37e   : > { %2229 = vst [vmem:[%s3836_s10 + $0x30] sm:$0xff] %v2221_v55  ;;  %2230 = vst [vmem:[%s3836_s10 + $0x38] sm:$0xff] %v2222_v17 }
 0x37f   : > { %2472 = shalt.err (!%p2469_p0)
}
 0x380   : > { %s2473_s20 = scalar_lea.hbm %s3870_s14, 1024  ;;  %s2477_s29 = scalar_lea.hbm %s3934_s6, 2048 }
 0x381   : > { %p2474_p1 = scmp.ne.s32.totalorder %s3870_s14, %s2473_s20  ;;  %p2478_p4 = scmp.lt.s32.totalorder %s3870_s14, %s3934_s6 }
 0x382   : > { %p2479_p7 = scmp.lt.s32.totalorder %s2477_s29, %s2473_s20 }
 0x383   : > { %p2475_p2 = pnand %p2474_p1, %p2612_p5 }
 0x384   : > { %p2480_p8 = por %p2479_p7, %p2478_p4 }
 0x385   : > { %p2476_p3 = pneg %p2475_p2 }
 0x387   : > { %p2481_p6 = pnand %p2480_p8, %p2476_p3 }
 0x389   : > { %2484 = shalt.err (!%p2481_p6)
}
 0x38a   : > { %s2537_s11 = smov 512   ;;  %s2538_s25 = smov 32  }
 0x38b   : > { %2353 = dma.vmem_to_hbm [thread:$0]  (%p2612_p5), %s3872_s12, 1024, %s3870_s14, %s3888_s15, %s2537_s11, %s2537_s11, %s2538_s25  }
 0x38c PF: > { %p2365_p9 = scmp.ge.s32.totalorder %s2523_s24, 2  ;;  %s2260_s13 = sand.u32 1, %s2511_s21  }
 0x38d   : > { %p3988_p10 = scmp.ne.s32.totalorder %s3939_s8, 0  ;;  %s2261_s16 = scalar_lea.sflag [#allocation5], %s2260_s13 }
 0x38f   : > { %p2360_p11 = pnand %p2365_p9, %p3988_p10 }
 0x391   : > { %p2361_p12 = pneg %p2360_p11 }
 0x393   : > { %2506 = dma.done.wait (%p2361_p12), %s2261_s16, 1024  }
 0x394   : > { %2508 = vsyncadd (%p2361_p12), %s2261_s16, 4294966272  ;;  %p17_p13 = scmp.ge.s32.totalorder %s2599_s27, 4   ;;  %s3989_s21 = smov %s2515_s22 }
 0x395   : > { %s3990_s22 = smov %s2519_s23  ;;  %s3991_s23 = smov %s2610_s30 }
 0x396   : > { %s3992_s24 = smov %s2599_s27  ;;  %19 = sbr.rel (!%p17_p13) target bundleno = 4 (0x4), region = 86 }
 0x39b   :  { %2266 = vsyncpa [#allocation4], 1 }
 0x39c   :  { %2268 = vsyncpa [#allocation4 + $0x1], 1 }
 0x39d   :  { %2269 = vsyncpa [#allocation5], 1 }
 0x39e   :  { %2271 = vsyncpa [#allocation5 + $0x1], 1 }

</bundles_post_ra>
